<compile_context>
chip_gen: v7x
topology: tpu7x:2x2x1
jax: 0.10.0
libtpu: 0.0.40
codegen_flags: <defaults>
</compile_context>

<pallas_src>
import jax
import jax.numpy as jnp
import numpy as np
from jax.experimental import pallas as pl
from jax.experimental.pallas import tpu as pltpu

_VMEM = pl.BlockSpec(memory_space=pltpu.MemorySpace.VMEM)

# (C_in, C_out, H_in, W_in, has_bn) per discriminator block.
_BLOCKS = ((1, 16, 32, 32, False),
           (16, 32, 16, 16, True),
           (32, 64, 8, 8, True),
           (64, 128, 4, 4, True))
_EPS = 0.8          # BatchNorm2d(out_filters, 0.8) -> eps = 0.8
_NEG_SLOPE = 0.2    # LeakyReLU(0.2)
_NUM_CLASSES = 10


# --------------------------------- kernel ----------------------------------- #
def _fused_forward_kernel(x_ref,
                          s0, m0, b0, t0,
                          s1, m1, b1, t1,
                          s2, m2, b2, t2,
                          s3, m3, b3, t3,
                          r_ref, wh_ref, bh_ref,
                          val_ref, lab_ref):
    def conv_block(a_bf, s_ref, m_ref, bias_ref, shift_ref):
        # a_bf: [B*Hin, Win*Cin] bf16 -> [B*Hout, Wout*Cout] f32
        acc = None
        for ky in range(3):
            rows = jnp.dot(s_ref[ky], a_bf, preferred_element_type=jnp.float32)
            part = jnp.dot(rows.astype(jnp.bfloat16), m_ref[ky],
                           preferred_element_type=jnp.float32)
            acc = part if acc is None else acc + part
        z = acc + bias_ref[...]                        # conv + (BN-scale-folded) bias
        z = jnp.where(z > 0, z, _NEG_SLOPE * z)        # LeakyReLU(0.2); Dropout2d = id (eval)
        return z + shift_ref[...]                      # BatchNorm shift (scale folded in W/b)

    a = x_ref[...].astype(jnp.bfloat16)                          # [B*32, 32]
    a = conv_block(a, s0, m0, b0, t0).astype(jnp.bfloat16)       # [B*16, 256]
    a = conv_block(a, s1, m1, b1, t1).astype(jnp.bfloat16)       # [B*8,  256]
    a = conv_block(a, s2, m2, b2, t2).astype(jnp.bfloat16)       # [B*4,  256]
    a = conv_block(a, s3, m3, b3, t3).astype(jnp.bfloat16)       # [B*2,  256]

    # Both heads with one matmul pair per final spatial row (col 0 = adv, 1.. = aux).
    logits = None
    for h in range(2):
        rows = jnp.dot(r_ref[h], a, preferred_element_type=jnp.float32)   # [B, 256]
        part = jnp.dot(rows.astype(jnp.bfloat16), wh_ref[h],
                       preferred_element_type=jnp.float32)                # [B, 11]
        logits = part if logits is None else logits + part
    logits = logits + bh_ref[...]

    adv = logits[:, 0:1]
    val_ref[...] = 0.5 * (jnp.tanh(0.5 * adv) + 1.0)   # numerically stable sigmoid

    aux = logits[:, 1:1 + _NUM_CLASSES]
    mx = jnp.max(aux, axis=-1, keepdims=True)
    e = jnp.exp(aux - mx)
    lab_ref[...] = e * pl.reciprocal(jnp.sum(e, axis=-1, keepdims=True), approx=True)


# ----------------------------- parameter setup ------------------------------ #
def init_torch_params(key):
    """Random weights in PyTorch layout (Conv2d: [Cout,Cin,3,3], Linear: [out,in])."""
    params = {}
    for i, (cin, cout, _hin, _win, bn) in enumerate(_BLOCKS):
        key, kw, kb, kg, kbe = jax.random.split(key, 5)
        w = 0.05 * jax.random.normal(kw, (cout, cin, 3, 3), jnp.float32)
        b = 0.05 * jax.random.normal(kb, (cout,), jnp.float32)
        if bn:
            gamma = 1.0 + 0.1 * jax.random.normal(kg, (cout,), jnp.float32)
            beta = 0.1 * jax.random.normal(kbe, (cout,), jnp.float32)
            run_mean = jnp.zeros((cout,), jnp.float32)
            run_var = jnp.ones((cout,), jnp.float32)
            scale = gamma / jnp.sqrt(run_var + _EPS)   # eval-mode BN, eps = 0.8
            shift = beta - run_mean * scale
        else:
            scale = jnp.ones((cout,), jnp.float32)
            shift = jnp.zeros((cout,), jnp.float32)
        params[f"conv{i}"] = (w, b, scale, shift)
    key, ka, kab, kx, kxb = jax.random.split(key, 5)
    d = 128 * 2 * 2
    params["heads"] = (0.05 * jax.random.normal(ka, (1, d), jnp.float32),
                       0.05 * jax.random.normal(kab, (1,), jnp.float32),
                       0.05 * jax.random.normal(kx, (_NUM_CLASSES, d), jnp.float32),
                       0.05 * jax.random.normal(kxb, (_NUM_CLASSES,), jnp.float32))
    return params


def pack_params(torch_params, batch):
    """Build the constant operand set consumed by the fused kernel."""
    packed = []
    for i, (cin, cout, hin, win, _) in enumerate(_BLOCKS):
        w, b, scale, shift = [np.asarray(a, np.float32)
                              for a in torch_params[f"conv{i}"]]
        assert np.all(scale > 0.0), "BN-scale folding into W/b requires scale > 0"
        hout, wout = hin // 2, win // 2

        # Fold BN scale into conv weights + bias; reorder to [ky, kx, Cin, Cout].
        wf = np.transpose(w, (2, 3, 1, 0)) * scale[None, None, None, :]
        bf = b * scale

        # One-hot row-selection (stride-2 + zero-pad gather over H), batch block-diag.
        s = np.zeros((3, batch * hout, batch * hin), np.float32)
        for ky in range(3):
            for hp in range(hout):
                h = 2 * hp + ky - 1
                if 0 <= h < hin:
                    for n in range(batch):
                        s[ky, n * hout + hp, n * hin + h] = 1.0

        # Fused column-gather x weights:
        #   m[ky, w*Cin + c, w'*Cout + c'] = wf[ky, kx, c, c']  with  w = 2w' + kx - 1.
        m = np.zeros((3, win * cin, wout * cout), np.float32)
        for ky in range(3):
            for kx in range(3):
                for wp in range(wout):
                    wcol = 2 * wp + kx - 1
                    if 0 <= wcol < win:
                        m[ky, wcol * cin:(wcol + 1) * cin,
                          wp * cout:(wp + 1) * cout] = wf[ky, kx]

        packed += [jnp.asarray(s, jnp.bfloat16),
                   jnp.asarray(m, jnp.bfloat16),
                   jnp.asarray(np.tile(bf, wout)[None, :], jnp.float32),
                   jnp.asarray(np.tile(shift, wout)[None, :], jnp.float32)]

    # Heads: combine adv (col 0) and aux (cols 1..10) into one matrix per final
    # spatial row h, rows permuted to the kernel's (w, c) lane order so no
    # flatten / transpose is needed in the forward pass.
    w_adv, b_adv, w_aux, b_aux = [np.asarray(a, np.float32)
                                  for a in torch_params["heads"]]
    cfin, hf, wfin = 128, 2, 2
    wh = np.zeros((hf, wfin * cfin, 1 + _NUM_CLASSES), np.float32)
    for h in range(hf):
        for wcol in range(wfin):
            for c in range(cfin):
                f = c * (hf * wfin) + h * wfin + wcol   # torch .view(B,-1) order (c,h,w)
                k = wcol * cfin + c                     # kernel lane order (w,c)
                wh[h, k, 0] = w_adv[0, f]
                wh[h, k, 1:] = w_aux[:, f]
    bh = np.concatenate([b_adv, b_aux])[None, :]

    r = np.zeros((hf, batch, batch * hf), np.float32)   # select spatial row h per image
    for h in range(hf):
        for n in range(batch):
            r[h, n, n * hf + h] = 1.0

    packed += [jnp.asarray(r, jnp.bfloat16),
               jnp.asarray(wh, jnp.bfloat16),
               jnp.asarray(bh, jnp.float32)]
    return tuple(packed)


# ------------------------------- forward pass -------------------------------- #
@jax.jit
def discriminator_forward(img_nchw, packed_params):
    batch = img_nchw.shape[0]
    # NCHW with C=1: [B,1,32,32] -> [B*32, 32]; rows = (batch,row), lanes = column.
    x0 = img_nchw.astype(jnp.float32).reshape(batch * 32, 32)
    validity, label = pl.pallas_call(
        _fused_forward_kernel,
        out_shape=(jax.ShapeDtypeStruct((batch, 1), jnp.float32),
                   jax.ShapeDtypeStruct((batch, _NUM_CLASSES), jnp.float32)),
        in_specs=[_VMEM] * (1 + len(packed_params)),
        out_specs=(_VMEM, _VMEM),
    )(x0, *packed_params)
    return validity, label


def reference_forward(img, torch_params):
    """Plain-JAX f32 reference with the same eval-mode semantics (validation only)."""
    x = img.astype(jnp.float32)
    for i, _ in enumerate(_BLOCKS):
        w, b, scale, shift = torch_params[f"conv{i}"]
        x = jax.lax.conv_general_dilated(
            x, w, window_strides=(2, 2), padding=((1, 1), (1, 1)),
            dimension_numbers=("NCHW", "OIHW", "NCHW"))
        x = x + b.reshape(1, -1, 1, 1)
        x = jnp.where(x > 0, x, _NEG_SLOPE * x)
        x = x * scale.reshape(1, -1, 1, 1) + shift.reshape(1, -1, 1, 1)
    feat = x.reshape(x.shape[0], -1)
    w_adv, b_adv, w_aux, b_aux = torch_params["heads"]
    validity = jax.nn.sigmoid(feat @ w_adv.T + b_adv)
    label = jax.nn.softmax(feat @ w_aux.T + b_aux, axis=-1)
    return validity, label


if __name__ == "__main__":
    key = jax.random.PRNGKey(0)
    kp, kimg = jax.random.split(key)
    batch = 2
    torch_params = init_torch_params(kp)
    packed = pack_params(torch_params, batch)
    img = jax.random.normal(kimg, (batch, 1, 32, 32), jnp.float32)

    validity, label = discriminator_forward(img, packed)
    jax.block_until_ready((validity, label))

    assert validity.shape == (batch, 1) and label.shape == (batch, _NUM_CLASSES)
    assert bool(jnp.all((validity > 0.0) & (validity < 1.0)))
    assert bool(jnp.allclose(jnp.sum(label, axis=1), 1.0, atol=1e-2))

    # Cross-check against the plain-JAX f32 reference (bf16 matmul tolerance).
    ref_val, ref_lab = reference_forward(img, torch_params)
    assert bool(jnp.allclose(validity, ref_val, atol=2e-2))
    assert bool(jnp.allclose(label, ref_lab, atol=2e-2))
    print("KERNEL_OK")
</pallas_src>

<mosaic_0001>
module attributes {stable_mosaic.version = 11 : i64} {
  func.func @_fused_forward_kernel(%arg0: memref<64x32xf32, #tpu.memory_space<vmem>>, %arg1: memref<3x32x64xbf16, #tpu.memory_space<vmem>>, %arg2: memref<3x32x256xbf16, #tpu.memory_space<vmem>>, %arg3: memref<1x256xf32, #tpu.memory_space<vmem>>, %arg4: memref<1x256xf32, #tpu.memory_space<vmem>>, %arg5: memref<3x16x32xbf16, #tpu.memory_space<vmem>>, %arg6: memref<3x256x256xbf16, #tpu.memory_space<vmem>>, %arg7: memref<1x256xf32, #tpu.memory_space<vmem>>, %arg8: memref<1x256xf32, #tpu.memory_space<vmem>>, %arg9: memref<3x8x16xbf16, #tpu.memory_space<vmem>>, %arg10: memref<3x256x256xbf16, #tpu.memory_space<vmem>>, %arg11: memref<1x256xf32, #tpu.memory_space<vmem>>, %arg12: memref<1x256xf32, #tpu.memory_space<vmem>>, %arg13: memref<3x4x8xbf16, #tpu.memory_space<vmem>>, %arg14: memref<3x256x256xbf16, #tpu.memory_space<vmem>>, %arg15: memref<1x256xf32, #tpu.memory_space<vmem>>, %arg16: memref<1x256xf32, #tpu.memory_space<vmem>>, %arg17: memref<2x2x4xbf16, #tpu.memory_space<vmem>>, %arg18: memref<2x256x11xbf16, #tpu.memory_space<vmem>>, %arg19: memref<1x11xf32, #tpu.memory_space<vmem>>, %arg20: memref<2x1xf32, #tpu.memory_space<vmem>>, %arg21: memref<2x10xf32, #tpu.memory_space<vmem>>) attributes {dimension_semantics = [], scalar_prefetch = 0 : i64, scratch_operands = 0 : i64, tpu.core_type = #tpu.core_type<tc>} {
    %c0 = arith.constant 0 : index
    %c0_0 = arith.constant 0 : index
    %0 = vector.load %arg0[%c0, %c0_0] : memref<64x32xf32, #tpu.memory_space<vmem>>, vector<64x32xf32>
    %1 = arith.truncf %0 : vector<64x32xf32> to vector<64x32xbf16>
    %c0_1 = arith.constant 0 : index
    %c0_2 = arith.constant 0 : index
    %c0_3 = arith.constant 0 : index
    %2 = vector.load %arg1[%c0_1, %c0_2, %c0_3] : memref<3x32x64xbf16, #tpu.memory_space<vmem>>, vector<1x32x64xbf16>
    %3 = vector.shape_cast %2 : vector<1x32x64xbf16> to vector<32x64xbf16>
    %cst = arith.constant dense<0.000000e+00> : vector<32x32xf32>
    %4 = tpu.matmul %3, %1, %cst {dimension_numbers = #tpu.dot_dimension_numbers<[1], [0], [0], [1], [0, 0, 1, 1], [], []>} : vector<32x64xbf16>, vector<64x32xbf16>, vector<32x32xf32> -> vector<32x32xf32>
    %5 = arith.truncf %4 : vector<32x32xf32> to vector<32x32xbf16>
    %c0_4 = arith.constant 0 : index
    %c0_5 = arith.constant 0 : index
    %c0_6 = arith.constant 0 : index
    %6 = vector.load %arg2[%c0_4, %c0_5, %c0_6] : memref<3x32x256xbf16, #tpu.memory_space<vmem>>, vector<1x32x256xbf16>
    %7 = vector.shape_cast %6 : vector<1x32x256xbf16> to vector<32x256xbf16>
    %cst_7 = arith.constant dense<0.000000e+00> : vector<32x256xf32>
    %8 = tpu.matmul %5, %7, %cst_7 {dimension_numbers = #tpu.dot_dimension_numbers<[1], [0], [0], [1], [0, 0, 1, 1], [], []>} : vector<32x32xbf16>, vector<32x256xbf16>, vector<32x256xf32> -> vector<32x256xf32>
    %c1 = arith.constant 1 : index
    %c0_8 = arith.constant 0 : index
    %c0_9 = arith.constant 0 : index
    %9 = vector.load %arg1[%c1, %c0_8, %c0_9] : memref<3x32x64xbf16, #tpu.memory_space<vmem>>, vector<1x32x64xbf16>
    %10 = vector.shape_cast %9 : vector<1x32x64xbf16> to vector<32x64xbf16>
    %cst_10 = arith.constant dense<0.000000e+00> : vector<32x32xf32>
    %11 = tpu.matmul %10, %1, %cst_10 {dimension_numbers = #tpu.dot_dimension_numbers<[1], [0], [0], [1], [0, 0, 1, 1], [], []>} : vector<32x64xbf16>, vector<64x32xbf16>, vector<32x32xf32> -> vector<32x32xf32>
    %12 = arith.truncf %11 : vector<32x32xf32> to vector<32x32xbf16>
    %c1_11 = arith.constant 1 : index
    %c0_12 = arith.constant 0 : index
    %c0_13 = arith.constant 0 : index
    %13 = vector.load %arg2[%c1_11, %c0_12, %c0_13] : memref<3x32x256xbf16, #tpu.memory_space<vmem>>, vector<1x32x256xbf16>
    %14 = vector.shape_cast %13 : vector<1x32x256xbf16> to vector<32x256xbf16>
    %cst_14 = arith.constant dense<0.000000e+00> : vector<32x256xf32>
    %15 = tpu.matmul %12, %14, %cst_14 {dimension_numbers = #tpu.dot_dimension_numbers<[1], [0], [0], [1], [0, 0, 1, 1], [], []>} : vector<32x32xbf16>, vector<32x256xbf16>, vector<32x256xf32> -> vector<32x256xf32>
    %16 = arith.addf %8, %15 : vector<32x256xf32>
    %c2 = arith.constant 2 : index
    %c0_15 = arith.constant 0 : index
    %c0_16 = arith.constant 0 : index
    %17 = vector.load %arg1[%c2, %c0_15, %c0_16] : memref<3x32x64xbf16, #tpu.memory_space<vmem>>, vector<1x32x64xbf16>
    %18 = vector.shape_cast %17 : vector<1x32x64xbf16> to vector<32x64xbf16>
    %cst_17 = arith.constant dense<0.000000e+00> : vector<32x32xf32>
    %19 = tpu.matmul %18, %1, %cst_17 {dimension_numbers = #tpu.dot_dimension_numbers<[1], [0], [0], [1], [0, 0, 1, 1], [], []>} : vector<32x64xbf16>, vector<64x32xbf16>, vector<32x32xf32> -> vector<32x32xf32>
    %20 = arith.truncf %19 : vector<32x32xf32> to vector<32x32xbf16>
    %c2_18 = arith.constant 2 : index
    %c0_19 = arith.constant 0 : index
    %c0_20 = arith.constant 0 : index
    %21 = vector.load %arg2[%c2_18, %c0_19, %c0_20] : memref<3x32x256xbf16, #tpu.memory_space<vmem>>, vector<1x32x256xbf16>
    %22 = vector.shape_cast %21 : vector<1x32x256xbf16> to vector<32x256xbf16>
    %cst_21 = arith.constant dense<0.000000e+00> : vector<32x256xf32>
    %23 = tpu.matmul %20, %22, %cst_21 {dimension_numbers = #tpu.dot_dimension_numbers<[1], [0], [0], [1], [0, 0, 1, 1], [], []>} : vector<32x32xbf16>, vector<32x256xbf16>, vector<32x256xf32> -> vector<32x256xf32>
    %24 = arith.addf %16, %23 : vector<32x256xf32>
    %c0_22 = arith.constant 0 : index
    %c0_23 = arith.constant 0 : index
    %25 = vector.load %arg3[%c0_22, %c0_23] : memref<1x256xf32, #tpu.memory_space<vmem>>, vector<1x256xf32>
    %26 = vector.broadcast %25 : vector<1x256xf32> to vector<32x256xf32>
    %27 = arith.addf %24, %26 : vector<32x256xf32>
    %cst_24 = arith.constant 0.000000e+00 : f32
    %28 = vector.broadcast %cst_24 : f32 to vector<32x256xf32>
    %29 = arith.cmpf ogt, %27, %28 : vector<32x256xf32>
    %cst_25 = arith.constant 2.000000e-01 : f32
    %30 = vector.broadcast %cst_25 : f32 to vector<32x256xf32>
    %31 = arith.mulf %30, %27 : vector<32x256xf32>
    %32 = arith.select %29, %27, %31 : vector<32x256xi1>, vector<32x256xf32>
    %c0_26 = arith.constant 0 : index
    %c0_27 = arith.constant 0 : index
    %33 = vector.load %arg4[%c0_26, %c0_27] : memref<1x256xf32, #tpu.memory_space<vmem>>, vector<1x256xf32>
    %34 = vector.broadcast %33 : vector<1x256xf32> to vector<32x256xf32>
    %35 = arith.addf %32, %34 : vector<32x256xf32>
    %36 = arith.truncf %35 : vector<32x256xf32> to vector<32x256xbf16>
    %c0_28 = arith.constant 0 : index
    %c0_29 = arith.constant 0 : index
    %c0_30 = arith.constant 0 : index
    %37 = vector.load %arg5[%c0_28, %c0_29, %c0_30] : memref<3x16x32xbf16, #tpu.memory_space<vmem>>, vector<1x16x32xbf16>
    %38 = vector.shape_cast %37 : vector<1x16x32xbf16> to vector<16x32xbf16>
    %cst_31 = arith.constant dense<0.000000e+00> : vector<16x256xf32>
    %39 = tpu.matmul %38, %36, %cst_31 {dimension_numbers = #tpu.dot_dimension_numbers<[1], [0], [0], [1], [0, 0, 1, 1], [], []>} : vector<16x32xbf16>, vector<32x256xbf16>, vector<16x256xf32> -> vector<16x256xf32>
    %40 = arith.truncf %39 : vector<16x256xf32> to vector<16x256xbf16>
    %c0_32 = arith.constant 0 : index
    %c0_33 = arith.constant 0 : index
    %c0_34 = arith.constant 0 : index
    %41 = vector.load %arg6[%c0_32, %c0_33, %c0_34] : memref<3x256x256xbf16, #tpu.memory_space<vmem>>, vector<1x256x256xbf16>
    %42 = vector.shape_cast %41 : vector<1x256x256xbf16> to vector<256x256xbf16>
    %cst_35 = arith.constant dense<0.000000e+00> : vector<16x256xf32>
    %43 = tpu.matmul %40, %42, %cst_35 {dimension_numbers = #tpu.dot_dimension_numbers<[1], [0], [0], [1], [0, 0, 1, 1], [], []>} : vector<16x256xbf16>, vector<256x256xbf16>, vector<16x256xf32> -> vector<16x256xf32>
    %c1_36 = arith.constant 1 : index
    %c0_37 = arith.constant 0 : index
    %c0_38 = arith.constant 0 : index
    %44 = vector.load %arg5[%c1_36, %c0_37, %c0_38] : memref<3x16x32xbf16, #tpu.memory_space<vmem>>, vector<1x16x32xbf16>
    %45 = vector.shape_cast %44 : vector<1x16x32xbf16> to vector<16x32xbf16>
    %cst_39 = arith.constant dense<0.000000e+00> : vector<16x256xf32>
    %46 = tpu.matmul %45, %36, %cst_39 {dimension_numbers = #tpu.dot_dimension_numbers<[1], [0], [0], [1], [0, 0, 1, 1], [], []>} : vector<16x32xbf16>, vector<32x256xbf16>, vector<16x256xf32> -> vector<16x256xf32>
    %47 = arith.truncf %46 : vector<16x256xf32> to vector<16x256xbf16>
    %c1_40 = arith.constant 1 : index
    %c0_41 = arith.constant 0 : index
    %c0_42 = arith.constant 0 : index
    %48 = vector.load %arg6[%c1_40, %c0_41, %c0_42] : memref<3x256x256xbf16, #tpu.memory_space<vmem>>, vector<1x256x256xbf16>
    %49 = vector.shape_cast %48 : vector<1x256x256xbf16> to vector<256x256xbf16>
    %cst_43 = arith.constant dense<0.000000e+00> : vector<16x256xf32>
    %50 = tpu.matmul %47, %49, %cst_43 {dimension_numbers = #tpu.dot_dimension_numbers<[1], [0], [0], [1], [0, 0, 1, 1], [], []>} : vector<16x256xbf16>, vector<256x256xbf16>, vector<16x256xf32> -> vector<16x256xf32>
    %51 = arith.addf %43, %50 : vector<16x256xf32>
    %c2_44 = arith.constant 2 : index
    %c0_45 = arith.constant 0 : index
    %c0_46 = arith.constant 0 : index
    %52 = vector.load %arg5[%c2_44, %c0_45, %c0_46] : memref<3x16x32xbf16, #tpu.memory_space<vmem>>, vector<1x16x32xbf16>
    %53 = vector.shape_cast %52 : vector<1x16x32xbf16> to vector<16x32xbf16>
    %cst_47 = arith.constant dense<0.000000e+00> : vector<16x256xf32>
    %54 = tpu.matmul %53, %36, %cst_47 {dimension_numbers = #tpu.dot_dimension_numbers<[1], [0], [0], [1], [0, 0, 1, 1], [], []>} : vector<16x32xbf16>, vector<32x256xbf16>, vector<16x256xf32> -> vector<16x256xf32>
    %55 = arith.truncf %54 : vector<16x256xf32> to vector<16x256xbf16>
    %c2_48 = arith.constant 2 : index
    %c0_49 = arith.constant 0 : index
    %c0_50 = arith.constant 0 : index
    %56 = vector.load %arg6[%c2_48, %c0_49, %c0_50] : memref<3x256x256xbf16, #tpu.memory_space<vmem>>, vector<1x256x256xbf16>
    %57 = vector.shape_cast %56 : vector<1x256x256xbf16> to vector<256x256xbf16>
    %cst_51 = arith.constant dense<0.000000e+00> : vector<16x256xf32>
    %58 = tpu.matmul %55, %57, %cst_51 {dimension_numbers = #tpu.dot_dimension_numbers<[1], [0], [0], [1], [0, 0, 1, 1], [], []>} : vector<16x256xbf16>, vector<256x256xbf16>, vector<16x256xf32> -> vector<16x256xf32>
    %59 = arith.addf %51, %58 : vector<16x256xf32>
    %c0_52 = arith.constant 0 : index
    %c0_53 = arith.constant 0 : index
    %60 = vector.load %arg7[%c0_52, %c0_53] : memref<1x256xf32, #tpu.memory_space<vmem>>, vector<1x256xf32>
    %61 = vector.broadcast %60 : vector<1x256xf32> to vector<16x256xf32>
    %62 = arith.addf %59, %61 : vector<16x256xf32>
    %cst_54 = arith.constant 0.000000e+00 : f32
    %63 = vector.broadcast %cst_54 : f32 to vector<16x256xf32>
    %64 = arith.cmpf ogt, %62, %63 : vector<16x256xf32>
    %cst_55 = arith.constant 2.000000e-01 : f32
    %65 = vector.broadcast %cst_55 : f32 to vector<16x256xf32>
    %66 = arith.mulf %65, %62 : vector<16x256xf32>
    %67 = arith.select %64, %62, %66 : vector<16x256xi1>, vector<16x256xf32>
    %c0_56 = arith.constant 0 : index
    %c0_57 = arith.constant 0 : index
    %68 = vector.load %arg8[%c0_56, %c0_57] : memref<1x256xf32, #tpu.memory_space<vmem>>, vector<1x256xf32>
    %69 = vector.broadcast %68 : vector<1x256xf32> to vector<16x256xf32>
    %70 = arith.addf %67, %69 : vector<16x256xf32>
    %71 = arith.truncf %70 : vector<16x256xf32> to vector<16x256xbf16>
    %c0_58 = arith.constant 0 : index
    %c0_59 = arith.constant 0 : index
    %c0_60 = arith.constant 0 : index
    %72 = vector.load %arg9[%c0_58, %c0_59, %c0_60] : memref<3x8x16xbf16, #tpu.memory_space<vmem>>, vector<1x8x16xbf16>
    %73 = vector.shape_cast %72 : vector<1x8x16xbf16> to vector<8x16xbf16>
    %cst_61 = arith.constant dense<0.000000e+00> : vector<8x256xf32>
    %74 = tpu.matmul %73, %71, %cst_61 {dimension_numbers = #tpu.dot_dimension_numbers<[1], [0], [0], [1], [0, 0, 1, 1], [], []>} : vector<8x16xbf16>, vector<16x256xbf16>, vector<8x256xf32> -> vector<8x256xf32>
    %75 = arith.truncf %74 : vector<8x256xf32> to vector<8x256xbf16>
    %c0_62 = arith.constant 0 : index
    %c0_63 = arith.constant 0 : index
    %c0_64 = arith.constant 0 : index
    %76 = vector.load %arg10[%c0_62, %c0_63, %c0_64] : memref<3x256x256xbf16, #tpu.memory_space<vmem>>, vector<1x256x256xbf16>
    %77 = vector.shape_cast %76 : vector<1x256x256xbf16> to vector<256x256xbf16>
    %cst_65 = arith.constant dense<0.000000e+00> : vector<8x256xf32>
    %78 = tpu.matmul %75, %77, %cst_65 {dimension_numbers = #tpu.dot_dimension_numbers<[1], [0], [0], [1], [0, 0, 1, 1], [], []>} : vector<8x256xbf16>, vector<256x256xbf16>, vector<8x256xf32> -> vector<8x256xf32>
    %c1_66 = arith.constant 1 : index
    %c0_67 = arith.constant 0 : index
    %c0_68 = arith.constant 0 : index
    %79 = vector.load %arg9[%c1_66, %c0_67, %c0_68] : memref<3x8x16xbf16, #tpu.memory_space<vmem>>, vector<1x8x16xbf16>
    %80 = vector.shape_cast %79 : vector<1x8x16xbf16> to vector<8x16xbf16>
    %cst_69 = arith.constant dense<0.000000e+00> : vector<8x256xf32>
    %81 = tpu.matmul %80, %71, %cst_69 {dimension_numbers = #tpu.dot_dimension_numbers<[1], [0], [0], [1], [0, 0, 1, 1], [], []>} : vector<8x16xbf16>, vector<16x256xbf16>, vector<8x256xf32> -> vector<8x256xf32>
    %82 = arith.truncf %81 : vector<8x256xf32> to vector<8x256xbf16>
    %c1_70 = arith.constant 1 : index
    %c0_71 = arith.constant 0 : index
    %c0_72 = arith.constant 0 : index
    %83 = vector.load %arg10[%c1_70, %c0_71, %c0_72] : memref<3x256x256xbf16, #tpu.memory_space<vmem>>, vector<1x256x256xbf16>
    %84 = vector.shape_cast %83 : vector<1x256x256xbf16> to vector<256x256xbf16>
    %cst_73 = arith.constant dense<0.000000e+00> : vector<8x256xf32>
    %85 = tpu.matmul %82, %84, %cst_73 {dimension_numbers = #tpu.dot_dimension_numbers<[1], [0], [0], [1], [0, 0, 1, 1], [], []>} : vector<8x256xbf16>, vector<256x256xbf16>, vector<8x256xf32> -> vector<8x256xf32>
    %86 = arith.addf %78, %85 : vector<8x256xf32>
    %c2_74 = arith.constant 2 : index
    %c0_75 = arith.constant 0 : index
    %c0_76 = arith.constant 0 : index
    %87 = vector.load %arg9[%c2_74, %c0_75, %c0_76] : memref<3x8x16xbf16, #tpu.memory_space<vmem>>, vector<1x8x16xbf16>
    %88 = vector.shape_cast %87 : vector<1x8x16xbf16> to vector<8x16xbf16>
    %cst_77 = arith.constant dense<0.000000e+00> : vector<8x256xf32>
    %89 = tpu.matmul %88, %71, %cst_77 {dimension_numbers = #tpu.dot_dimension_numbers<[1], [0], [0], [1], [0, 0, 1, 1], [], []>} : vector<8x16xbf16>, vector<16x256xbf16>, vector<8x256xf32> -> vector<8x256xf32>
    %90 = arith.truncf %89 : vector<8x256xf32> to vector<8x256xbf16>
    %c2_78 = arith.constant 2 : index
    %c0_79 = arith.constant 0 : index
    %c0_80 = arith.constant 0 : index
    %91 = vector.load %arg10[%c2_78, %c0_79, %c0_80] : memref<3x256x256xbf16, #tpu.memory_space<vmem>>, vector<1x256x256xbf16>
    %92 = vector.shape_cast %91 : vector<1x256x256xbf16> to vector<256x256xbf16>
    %cst_81 = arith.constant dense<0.000000e+00> : vector<8x256xf32>
    %93 = tpu.matmul %90, %92, %cst_81 {dimension_numbers = #tpu.dot_dimension_numbers<[1], [0], [0], [1], [0, 0, 1, 1], [], []>} : vector<8x256xbf16>, vector<256x256xbf16>, vector<8x256xf32> -> vector<8x256xf32>
    %94 = arith.addf %86, %93 : vector<8x256xf32>
    %c0_82 = arith.constant 0 : index
    %c0_83 = arith.constant 0 : index
    %95 = vector.load %arg11[%c0_82, %c0_83] : memref<1x256xf32, #tpu.memory_space<vmem>>, vector<1x256xf32>
    %96 = vector.broadcast %95 : vector<1x256xf32> to vector<8x256xf32>
    %97 = arith.addf %94, %96 : vector<8x256xf32>
    %cst_84 = arith.constant 0.000000e+00 : f32
    %98 = vector.broadcast %cst_84 : f32 to vector<8x256xf32>
    %99 = arith.cmpf ogt, %97, %98 : vector<8x256xf32>
    %cst_85 = arith.constant 2.000000e-01 : f32
    %100 = vector.broadcast %cst_85 : f32 to vector<8x256xf32>
    %101 = arith.mulf %100, %97 : vector<8x256xf32>
    %102 = arith.select %99, %97, %101 : vector<8x256xi1>, vector<8x256xf32>
    %c0_86 = arith.constant 0 : index
    %c0_87 = arith.constant 0 : index
    %103 = vector.load %arg12[%c0_86, %c0_87] : memref<1x256xf32, #tpu.memory_space<vmem>>, vector<1x256xf32>
    %104 = vector.broadcast %103 : vector<1x256xf32> to vector<8x256xf32>
    %105 = arith.addf %102, %104 : vector<8x256xf32>
    %106 = arith.truncf %105 : vector<8x256xf32> to vector<8x256xbf16>
    %c0_88 = arith.constant 0 : index
    %c0_89 = arith.constant 0 : index
    %c0_90 = arith.constant 0 : index
    %107 = vector.load %arg13[%c0_88, %c0_89, %c0_90] : memref<3x4x8xbf16, #tpu.memory_space<vmem>>, vector<1x4x8xbf16>
    %108 = vector.shape_cast %107 : vector<1x4x8xbf16> to vector<4x8xbf16>
    %cst_91 = arith.constant dense<0.000000e+00> : vector<4x256xf32>
    %109 = tpu.matmul %108, %106, %cst_91 {dimension_numbers = #tpu.dot_dimension_numbers<[1], [0], [0], [1], [0, 0, 1, 1], [], []>} : vector<4x8xbf16>, vector<8x256xbf16>, vector<4x256xf32> -> vector<4x256xf32>
    %110 = arith.truncf %109 : vector<4x256xf32> to vector<4x256xbf16>
    %c0_92 = arith.constant 0 : index
    %c0_93 = arith.constant 0 : index
    %c0_94 = arith.constant 0 : index
    %111 = vector.load %arg14[%c0_92, %c0_93, %c0_94] : memref<3x256x256xbf16, #tpu.memory_space<vmem>>, vector<1x256x256xbf16>
    %112 = vector.shape_cast %111 : vector<1x256x256xbf16> to vector<256x256xbf16>
    %cst_95 = arith.constant dense<0.000000e+00> : vector<4x256xf32>
    %113 = tpu.matmul %110, %112, %cst_95 {dimension_numbers = #tpu.dot_dimension_numbers<[1], [0], [0], [1], [0, 0, 1, 1], [], []>} : vector<4x256xbf16>, vector<256x256xbf16>, vector<4x256xf32> -> vector<4x256xf32>
    %c1_96 = arith.constant 1 : index
    %c0_97 = arith.constant 0 : index
    %c0_98 = arith.constant 0 : index
    %114 = vector.load %arg13[%c1_96, %c0_97, %c0_98] : memref<3x4x8xbf16, #tpu.memory_space<vmem>>, vector<1x4x8xbf16>
    %115 = vector.shape_cast %114 : vector<1x4x8xbf16> to vector<4x8xbf16>
    %cst_99 = arith.constant dense<0.000000e+00> : vector<4x256xf32>
    %116 = tpu.matmul %115, %106, %cst_99 {dimension_numbers = #tpu.dot_dimension_numbers<[1], [0], [0], [1], [0, 0, 1, 1], [], []>} : vector<4x8xbf16>, vector<8x256xbf16>, vector<4x256xf32> -> vector<4x256xf32>
    %117 = arith.truncf %116 : vector<4x256xf32> to vector<4x256xbf16>
    %c1_100 = arith.constant 1 : index
    %c0_101 = arith.constant 0 : index
    %c0_102 = arith.constant 0 : index
    %118 = vector.load %arg14[%c1_100, %c0_101, %c0_102] : memref<3x256x256xbf16, #tpu.memory_space<vmem>>, vector<1x256x256xbf16>
    %119 = vector.shape_cast %118 : vector<1x256x256xbf16> to vector<256x256xbf16>
    %cst_103 = arith.constant dense<0.000000e+00> : vector<4x256xf32>
    %120 = tpu.matmul %117, %119, %cst_103 {dimension_numbers = #tpu.dot_dimension_numbers<[1], [0], [0], [1], [0, 0, 1, 1], [], []>} : vector<4x256xbf16>, vector<256x256xbf16>, vector<4x256xf32> -> vector<4x256xf32>
    %121 = arith.addf %113, %120 : vector<4x256xf32>
    %c2_104 = arith.constant 2 : index
    %c0_105 = arith.constant 0 : index
    %c0_106 = arith.constant 0 : index
    %122 = vector.load %arg13[%c2_104, %c0_105, %c0_106] : memref<3x4x8xbf16, #tpu.memory_space<vmem>>, vector<1x4x8xbf16>
    %123 = vector.shape_cast %122 : vector<1x4x8xbf16> to vector<4x8xbf16>
    %cst_107 = arith.constant dense<0.000000e+00> : vector<4x256xf32>
    %124 = tpu.matmul %123, %106, %cst_107 {dimension_numbers = #tpu.dot_dimension_numbers<[1], [0], [0], [1], [0, 0, 1, 1], [], []>} : vector<4x8xbf16>, vector<8x256xbf16>, vector<4x256xf32> -> vector<4x256xf32>
    %125 = arith.truncf %124 : vector<4x256xf32> to vector<4x256xbf16>
    %c2_108 = arith.constant 2 : index
    %c0_109 = arith.constant 0 : index
    %c0_110 = arith.constant 0 : index
    %126 = vector.load %arg14[%c2_108, %c0_109, %c0_110] : memref<3x256x256xbf16, #tpu.memory_space<vmem>>, vector<1x256x256xbf16>
    %127 = vector.shape_cast %126 : vector<1x256x256xbf16> to vector<256x256xbf16>
    %cst_111 = arith.constant dense<0.000000e+00> : vector<4x256xf32>
    %128 = tpu.matmul %125, %127, %cst_111 {dimension_numbers = #tpu.dot_dimension_numbers<[1], [0], [0], [1], [0, 0, 1, 1], [], []>} : vector<4x256xbf16>, vector<256x256xbf16>, vector<4x256xf32> -> vector<4x256xf32>
    %129 = arith.addf %121, %128 : vector<4x256xf32>
    %c0_112 = arith.constant 0 : index
    %c0_113 = arith.constant 0 : index
    %130 = vector.load %arg15[%c0_112, %c0_113] : memref<1x256xf32, #tpu.memory_space<vmem>>, vector<1x256xf32>
    %131 = vector.broadcast %130 : vector<1x256xf32> to vector<4x256xf32>
    %132 = arith.addf %129, %131 : vector<4x256xf32>
    %cst_114 = arith.constant 0.000000e+00 : f32
    %133 = vector.broadcast %cst_114 : f32 to vector<4x256xf32>
    %134 = arith.cmpf ogt, %132, %133 : vector<4x256xf32>
    %cst_115 = arith.constant 2.000000e-01 : f32
    %135 = vector.broadcast %cst_115 : f32 to vector<4x256xf32>
    %136 = arith.mulf %135, %132 : vector<4x256xf32>
    %137 = arith.select %134, %132, %136 : vector<4x256xi1>, vector<4x256xf32>
    %c0_116 = arith.constant 0 : index
    %c0_117 = arith.constant 0 : index
    %138 = vector.load %arg16[%c0_116, %c0_117] : memref<1x256xf32, #tpu.memory_space<vmem>>, vector<1x256xf32>
    %139 = vector.broadcast %138 : vector<1x256xf32> to vector<4x256xf32>
    %140 = arith.addf %137, %139 : vector<4x256xf32>
    %141 = arith.truncf %140 : vector<4x256xf32> to vector<4x256xbf16>
    %c0_118 = arith.constant 0 : index
    %c0_119 = arith.constant 0 : index
    %c0_120 = arith.constant 0 : index
    %142 = vector.load %arg17[%c0_118, %c0_119, %c0_120] : memref<2x2x4xbf16, #tpu.memory_space<vmem>>, vector<1x2x4xbf16>
    %143 = vector.shape_cast %142 : vector<1x2x4xbf16> to vector<2x4xbf16>
    %cst_121 = arith.constant dense<0.000000e+00> : vector<2x256xf32>
    %144 = tpu.matmul %143, %141, %cst_121 {dimension_numbers = #tpu.dot_dimension_numbers<[1], [0], [0], [1], [0, 0, 1, 1], [], []>} : vector<2x4xbf16>, vector<4x256xbf16>, vector<2x256xf32> -> vector<2x256xf32>
    %145 = arith.truncf %144 : vector<2x256xf32> to vector<2x256xbf16>
    %c0_122 = arith.constant 0 : index
    %c0_123 = arith.constant 0 : index
    %c0_124 = arith.constant 0 : index
    %146 = vector.load %arg18[%c0_122, %c0_123, %c0_124] : memref<2x256x11xbf16, #tpu.memory_space<vmem>>, vector<1x256x11xbf16>
    %147 = vector.shape_cast %146 : vector<1x256x11xbf16> to vector<256x11xbf16>
    %cst_125 = arith.constant dense<0.000000e+00> : vector<2x11xf32>
    %148 = tpu.matmul %145, %147, %cst_125 {dimension_numbers = #tpu.dot_dimension_numbers<[1], [0], [0], [1], [0, 0, 1, 1], [], []>} : vector<2x256xbf16>, vector<256x11xbf16>, vector<2x11xf32> -> vector<2x11xf32>
    %c1_126 = arith.constant 1 : index
    %c0_127 = arith.constant 0 : index
    %c0_128 = arith.constant 0 : index
    %149 = vector.load %arg17[%c1_126, %c0_127, %c0_128] : memref<2x2x4xbf16, #tpu.memory_space<vmem>>, vector<1x2x4xbf16>
    %150 = vector.shape_cast %149 : vector<1x2x4xbf16> to vector<2x4xbf16>
    %cst_129 = arith.constant dense<0.000000e+00> : vector<2x256xf32>
    %151 = tpu.matmul %150, %141, %cst_129 {dimension_numbers = #tpu.dot_dimension_numbers<[1], [0], [0], [1], [0, 0, 1, 1], [], []>} : vector<2x4xbf16>, vector<4x256xbf16>, vector<2x256xf32> -> vector<2x256xf32>
    %152 = arith.truncf %151 : vector<2x256xf32> to vector<2x256xbf16>
    %c1_130 = arith.constant 1 : index
    %c0_131 = arith.constant 0 : index
    %c0_132 = arith.constant 0 : index
    %153 = vector.load %arg18[%c1_130, %c0_131, %c0_132] : memref<2x256x11xbf16, #tpu.memory_space<vmem>>, vector<1x256x11xbf16>
    %154 = vector.shape_cast %153 : vector<1x256x11xbf16> to vector<256x11xbf16>
    %cst_133 = arith.constant dense<0.000000e+00> : vector<2x11xf32>
    %155 = tpu.matmul %152, %154, %cst_133 {dimension_numbers = #tpu.dot_dimension_numbers<[1], [0], [0], [1], [0, 0, 1, 1], [], []>} : vector<2x256xbf16>, vector<256x11xbf16>, vector<2x11xf32> -> vector<2x11xf32>
    %156 = arith.addf %148, %155 : vector<2x11xf32>
    %c0_134 = arith.constant 0 : index
    %c0_135 = arith.constant 0 : index
    %157 = vector.load %arg19[%c0_134, %c0_135] : memref<1x11xf32, #tpu.memory_space<vmem>>, vector<1x11xf32>
    %158 = vector.broadcast %157 : vector<1x11xf32> to vector<2x11xf32>
    %159 = arith.addf %156, %158 : vector<2x11xf32>
    %160 = vector.extract_strided_slice %159 {offsets = [0, 0], sizes = [2, 1], strides = [1, 1]} : vector<2x11xf32> to vector<2x1xf32>
    %cst_136 = arith.constant 5.000000e-01 : f32
    %161 = vector.broadcast %cst_136 : f32 to vector<2x1xf32>
    %162 = arith.mulf %161, %160 : vector<2x1xf32>
    %163 = math.tanh %162 : vector<2x1xf32>
    %cst_137 = arith.constant 1.000000e+00 : f32
    %164 = vector.broadcast %cst_137 : f32 to vector<2x1xf32>
    %165 = arith.addf %163, %164 : vector<2x1xf32>
    %cst_138 = arith.constant 5.000000e-01 : f32
    %166 = vector.broadcast %cst_138 : f32 to vector<2x1xf32>
    %167 = arith.mulf %166, %165 : vector<2x1xf32>
    %c0_139 = arith.constant 0 : index
    %c0_140 = arith.constant 0 : index
    %168 = vector.load %arg20[%c0_139, %c0_140] : memref<2x1xf32, #tpu.memory_space<vmem>>, vector<2x1xf32>
    tpu.vector_store %arg20[%c0_139, %c0_140], %167 {strides = array<i32>} : memref<2x1xf32, #tpu.memory_space<vmem>>, vector<2x1xf32>,
    %169 = vector.extract_strided_slice %159 {offsets = [0, 1], sizes = [2, 10], strides = [1, 1]} : vector<2x11xf32> to vector<2x10xf32>
    %cst_141 = arith.constant dense<0xFF800000> : vector<2xf32>
    %170 = vector.multi_reduction <maximumf>, %169, %cst_141 [1] : vector<2x10xf32> to vector<2xf32>
    %171 = vector.shape_cast %170 : vector<2xf32> to vector<2x1xf32>
    %172 = vector.broadcast %171 : vector<2x1xf32> to vector<2x10xf32>
    %173 = arith.subf %169, %172 : vector<2x10xf32>
    %174 = math.exp %173 : vector<2x10xf32>
    %cst_142 = arith.constant dense<0.000000e+00> : vector<2xf32>
    %175 = vector.multi_reduction <add>, %174, %cst_142 [1] : vector<2x10xf32> to vector<2xf32>
    %176 = vector.shape_cast %175 : vector<2xf32> to vector<2x1xf32>
    %177 = tpu.reciprocal %176 {approx = true} : vector<2x1xf32> -> vector<2x1xf32>
    %178 = vector.broadcast %177 : vector<2x1xf32> to vector<2x10xf32>
    %179 = arith.mulf %174, %178 : vector<2x10xf32>
    %c0_143 = arith.constant 0 : index
    %c0_144 = arith.constant 0 : index
    %180 = vector.load %arg21[%c0_143, %c0_144] : memref<2x10xf32, #tpu.memory_space<vmem>>, vector<2x10xf32>
    tpu.vector_store %arg21[%c0_143, %c0_144], %179 {strides = array<i32>} : memref<2x10xf32, #tpu.memory_space<vmem>>, vector<2x10xf32>,
    return
  }
}

</mosaic_0001>

<bundles_post_ra>
// kernel: discriminator_forward.1
= control target key start
LH: loop header
LB: loop body
LE: loop exit
PB: predicated region body
PF: predicated region fallthrough
CT: control target
= control target key end

     0   :  { %s5563_s0 = inlined_call_operand.vmem [shape: f32[64,32], index: 0, kind: input, shape index: {}]   ;;  %s5564_s1 = inlined_call_operand.vmem [shape: bf16[3,32,64], index: 1, kind: input, shape index: {}]   ;;  %s5565_s2 = inlined_call_operand.vmem [shape: bf16[3,32,256], index: 2, kind: input, shape index: {}]   ;;  %s5566_s3 = inlined_call_operand.vmem [shape: f32[1,256], index: 3, kind: input, shape index: {}]   ;;  %s5567_s4 = inlined_call_operand.vmem [shape: f32[1,256], index: 4, kind: input, shape index: {}]   ;;  %s5568_s5 = inlined_call_operand.vmem [shape: bf16[3,16,32], index: 5, kind: input, shape index: {}]   ;;  %s5569_s6 = inlined_call_operand.hbm [shape: bf16[3,256,256], index: 6, kind: input, shape index: {}]   ;;  %s5570_s7 = inlined_call_operand.vmem [shape: f32[1,256], index: 7, kind: input, shape index: {}]   ;;  %s5571_s8 = inlined_call_operand.vmem [shape: f32[1,256], index: 8, kind: input, shape index: {}]   ;;  %s5572_s9 = inlined_call_operand.vmem [shape: bf16[3,8,16], index: 9, kind: input, shape index: {}]   ;;  %s5573_s10 = inlined_call_operand.hbm [shape: bf16[3,256,256], index: 10, kind: input, shape index: {}]   ;;  %s5574_s11 = inlined_call_operand.vmem [shape: f32[1,256], index: 11, kind: input, shape index: {}]   ;;  %s5575_s12 = inlined_call_operand.vmem [shape: f32[1,256], index: 12, kind: input, shape index: {}]   ;;  %s5576_s13 = inlined_call_operand.vmem [shape: bf16[3,4,8], index: 13, kind: input, shape index: {}]   ;;  %s5577_s14 = inlined_call_operand.hbm [shape: bf16[3,256,256], index: 14, kind: input, shape index: {}]   ;;  %s5578_s15 = inlined_call_operand.vmem [shape: f32[1,256], index: 15, kind: input, shape index: {}]   ;;  %s5579_s16 = inlined_call_operand.vmem [shape: f32[1,256], index: 16, kind: input, shape index: {}]   ;;  %s5580_s17 = inlined_call_operand.vmem [shape: bf16[2,2,4], index: 17, kind: input, shape index: {}]   ;;  %s5581_s18 = inlined_call_operand.vmem [shape: bf16[2,256,11], index: 18, kind: input, shape index: {}]   ;;  %s5582_s19 = inlined_call_operand.vmem [shape: f32[1,11], index: 19, kind: input, shape index: {}]   ;;  %s5583_s20 = inlined_call_operand.vmem [shape: f32[2,1], index: 20, kind: output, shape index: {0}]   ;;  %s5584_s21 = inlined_call_operand.hbm [shape: f32[2,10], index: 21, kind: output, shape index: {1}]  }
   0x1   :  { %5589 = sst [smem:[#allocation12_spill]] %s5563_s0 }
   0x2   :  { %5590 = sst [smem:[#allocation13_spill]] %s5564_s1 }
   0x3   :  { %5591 = sst [smem:[#allocation14_spill]] %s5565_s2 }
   0x4   :  { %5592 = sst [smem:[#allocation15_spill]] %s5566_s3 }
   0x5   :  { %5593 = sst [smem:[#allocation16_spill]] %s5567_s4 }
   0x6   :  { %5594 = sst [smem:[#allocation17_spill]] %s5568_s5 }
   0x7   :  { %27 = vsyncpa [#allocation3], 0 }
   0x8   :  { %28 = vsyncpa [#allocation6], 0 }
   0x9   :  { %29 = vsyncpa [#allocation4], 0  ;;  %s5007_s2 = smov [#allocation5]   ;;  %s5008_s26 = smov [#allocation2]  }
   0xa   :  { %s65_s25 = sshll.u32 %s5007_s2, 4  ;;  %s47_s27 = sshll.u32 %s5008_s26, 4  ;;  %s66_s25 = int_to_ptr.vmem [resolvable:$true] %s65_s25  ;;  %s5125_s27 = int_to_ptr.vmem [resolvable:$true] %s47_s27 }
   0xb   :  { %s4913_s29 = scalar_lea.hbm %s5573_s10, 12288 }
   0xc   :  { %p4914_p0 = scmp.ne.s32.totalorder %s5573_s10, %s4913_s29  ;;  %p4917_p1 = scmp.lt.u32.totalorder %s4913_s29, %s5573_s10 }
   0xe   :  { %p4919_p2 = pnand %p4917_p1, %p4914_p0 }
  0x10   :  { %4922 = shalt.err (!%p4919_p2)
}
  0x11   :  { %s4923_s22 = scalar_lea.vmem %s66_s25, 12288  ;;  %p4928_p4 = scmp.lt.s32.totalorder %s66_s25, %s66_s25 }
  0x12   :  { %p4924_p3 = scmp.ne.s32.totalorder %s66_s25, %s4923_s22  ;;  %p4929_p5 = scmp.lt.s32.totalorder %s4923_s22, %s4923_s22 }
  0x14   :  { %p4930_p6 = por %p4929_p5, %p4928_p4 }
  0x16   :  { %p4931_p7 = pnand %p4930_p6, %p4924_p3 }
  0x18   :  { %4934 = shalt.err (!%p4931_p7)
}
  0x19   :  { %s5009_s23 = smov 128   ;;  %s5010_s1 = smov 8  }
  0x1a   :  { %71 = dma.hbm_to_vmem [thread:$0]  %s5573_s10, 12288, %s66_s25, [#allocation6], %s5009_s23, %s5009_s23, %s5010_s1  }
  0x1b   :  { %s4935_s28 = scalar_lea.hbm %s5569_s6, 12288 }
  0x1c   :  { %p4936_p8 = scmp.ne.s32.totalorder %s5569_s6, %s4935_s28  ;;  %p4939_p9 = scmp.lt.u32.totalorder %s4935_s28, %s5569_s6 }
  0x1e   :  { %p4941_p10 = pnand %p4939_p9, %p4936_p8 }
  0x20   :  { %4944 = shalt.err (!%p4941_p10)
}
  0x21   :  { %s4945_s5 = scalar_lea.vmem %s5125_s27, 12288  ;;  %p4950_p12 = scmp.lt.s32.totalorder %s5125_s27, %s5125_s27 }
  0x22   :  { %p4946_p11 = scmp.ne.s32.totalorder %s5125_s27, %s4945_s5  ;;  %p4951_p13 = scmp.lt.s32.totalorder %s4945_s5, %s4945_s5 }
  0x24   :  { %p4952_p0 = por %p4951_p13, %p4950_p12 }
  0x26   :  { %p4953_p1 = pnand %p4952_p0, %p4946_p11 }
  0x28   :  { %4956 = shalt.err (!%p4953_p1)
}
  0x29   :  { %53 = dma.hbm_to_vmem [thread:$0]  %s5569_s6, 12288, %s5125_s27, [#allocation3], %s5009_s23, %s5009_s23, %s5010_s1  }
  0x2a   :  { %s5011_s22 = smov [#allocation7]   ;;  %s4957_s3 = scalar_lea.hbm %s5577_s14, 12288 }
  0x2b   :  { %s83_s24 = sshll.u32 %s5011_s22, 4  ;;  %p4958_p2 = scmp.ne.s32.totalorder %s5577_s14, %s4957_s3  ;;  %s84_s24 = int_to_ptr.vmem [resolvable:$true] %s83_s24 }
  0x2c   :  { %p4961_p3 = scmp.lt.u32.totalorder %s4957_s3, %s5577_s14 }
  0x2e   :  { %p4963_p4 = pnand %p4961_p3, %p4958_p2 }
  0x30   :  { %4966 = shalt.err (!%p4963_p4)
}
  0x31   :  { %s4967_s30 = scalar_lea.vmem %s84_s24, 12288  ;;  %p4972_p6 = scmp.lt.s32.totalorder %s84_s24, %s84_s24 }
  0x32   :  { %p4968_p5 = scmp.ne.s32.totalorder %s84_s24, %s4967_s30  ;;  %p4973_p7 = scmp.lt.s32.totalorder %s4967_s30, %s4967_s30 }
  0x34   :  { %p4974_p8 = por %p4973_p7, %p4972_p6 }
  0x36   :  { %p4975_p9 = pnand %p4974_p8, %p4968_p5 }
  0x38   :  { %4978 = shalt.err (!%p4975_p9)
}
  0x39   :  { %89 = dma.hbm_to_vmem [thread:$0]  %s5577_s14, 12288, %s84_s24, [#allocation6], %s5009_s23, %s5009_s23, %s5010_s1  }
  0x3a   :  { %5001 = dma.done.wait [#allocation3], 12288  }
  0x3b   :  { %5002 = vsyncadd [#allocation3], 4294955008 }
  0x3c   :  { %5003 = dma.done.wait [#allocation6], 24576  }
  0x3d   :  { %5004 = vsyncadd [#allocation6], 4294942720  ;;  %s5595_s25 = sld [smem:[#allocation12_spill]]  ;;  %vm136_vm0 = vcmask 523264   ;;  %s5596_s30 = sld [smem:[#allocation13_spill]]  ;;  %v5012_v20 = vmov 0   ;;  %v600_v49 = vlaneseq }
  0x3e   :  { %s5597_s28 = sld [smem:[#allocation14_spill]]  ;;  %vm295_vm1 = vcmask 261120   ;;  %s5598_s26 = sld [smem:[#allocation15_spill]]  ;;  %vm1591_vm14 = vcmask 130048  }
  0x3f   :  { %v601_v50 = vshrl.u32 %v600_v49, 7  ;;  %s5599_s14 = sld [smem:[#allocation16_spill]]  ;;  %s5600_s24 = sld [smem:[#allocation17_spill]]  ;;  %v4454_v49 = vld [vmem:[#allocation2 + $0x134] ss:$8 sps:$4 sm:$0xff]  }
  0x40   :  { %s5014_s1 = smov [#allocation8]  }
  0x41   :  { %v5299_v51 = vsub.s32 0, %v601_v50  ;;  %v5304_v53 = vsub.s32 1, %v601_v50  ;;  %v4452_v50 = vld [vmem:[#allocation2 + $0x130] ss:$8 sps:$4 sm:$0xff]  }
  0x43   :  { %v110_v0 = vld [vmem:[%s5595_s25] sm:$0xff]  ;;  %v111_v1 = vld [vmem:[%s5595_s25 + $0x8] sm:$0xff]  ;;  %v112_v2 = vld [vmem:[%s5595_s25 + $0x10] sm:$0xff] }
  0x44   :  { %v5186_v3 = vpack.c.bf16 %v111_v1, %v110_v0  ;;  %v113_v4 = vld [vmem:[%s5595_s25 + $0x18] sm:$0xff]  ;;  %v114_v6 = vld [vmem:[%s5595_s25 + $0x20] sm:$0xff]  ;;  %v115_v7 = vld [vmem:[%s5595_s25 + $0x28] sm:$0xff] }
  0x45   :  { %v5191_v5 = vpack.c.bf16 %v113_v4, %v112_v2  ;;  %v4416_v8 = vld [vmem:[%s5596_s30 + $0x10] sm:$0xff]   ;;  %v5210_v10 = vpack.c.bf16 %v115_v7, %v114_v6  ;;  %v4418_v11 = vld [vmem:[%s5596_s30] sm:$0xff]   ;;  %v117_v12 = vld [vmem:[%s5595_s25 + $0x38] sm:$0xff] }
  0x46   :  { %4360 = vmatprep.subr.bf16.mxu1 %v5186_v3  ;;  %4348 = vmatprep.subr.bf16.mxu0 %v5186_v3  ;;  %v116_v9 = vld [vmem:[%s5595_s25 + $0x30] sm:$0xff]  ;;  %v4422_v14 = vld [vmem:[%s5597_s28 + $0x24] ss:$8 sps:$4 sm:$0xff]   ;;  %v4417_v15 = vld [vmem:[%s5596_s30 + $0x18] sm:$0xff]  }
  0x47   :  { %4361 = vmatpush3.bf16.msra.mxu1 %v5186_v3  ;;  %4349 = vmatpush3.bf16.msra.mxu0 %v5186_v3  ;;  %v121_v13 = vpack.c.bf16 %v117_v12, %v116_v9  ;;  %v4419_v16 = vld [vmem:[%s5596_s30 + $0x8] sm:$0xff]   ;;  %v4425_v18 = vld [vmem:[%s5597_s28 + $0x34] ss:$8 sps:$4 sm:$0xff]   ;;  %v4423_v19 = vld [vmem:[%s5597_s28 + $0x30] ss:$8 sps:$4 sm:$0xff]  }
  0x48   :  { %4362 = vmatprep.subr.bf16.mxu1 %v5191_v5  ;;  %4368 = vmatprep.mubr.msk.bf16.mxu1 %vm136_vm0, %v4416_v8  ;;  %v4420_v17 = vld [vmem:[%s5597_s28 + $0x20] ss:$8 sps:$4 sm:$0xff]   ;;  %v4428_v21 = vld [vmem:[%s5597_s28 + $0x4] ss:$8 sps:$4 sm:$0xff]   ;;  %v4431_v35 = vld [vmem:[%s5597_s28 + $0x14] ss:$8 sps:$4 sm:$0xff]  }
  0x49   :  { %4350 = vmatprep.subr.bf16.mxu0 %v5191_v5  ;;  %4356 = vmatprep.mubr.msk.bf16.mxu0 %vm136_vm0, %v4418_v11  ;;  %v4426_v30 = vld [vmem:[%s5597_s28] ss:$8 sps:$4 sm:$0xff]   ;;  %v4429_v36 = vld [vmem:[%s5597_s28 + $0x10] ss:$8 sps:$4 sm:$0xff]   ;;  %v4436_v38 = vld [vmem:[%s5597_s28 + $0x44] ss:$8 sps:$4 sm:$0xff]  }
  0x4a   :  { %v4432_v37 = vld [vmem:[%s5596_s30 + $0x20] sm:$0xff]   ;;  %v4433_v39 = vld [vmem:[%s5596_s30 + $0x28] sm:$0xff]   ;;  %v4439_v41 = vld [vmem:[%s5597_s28 + $0x54] ss:$8 sps:$4 sm:$0xff]  }
  0x4b   :  { %4363 = vmatpush3.bf16.msra.mxu1 %v5191_v5  ;;  %4351 = vmatpush3.bf16.msra.mxu0 %v5191_v5  ;;  %v4434_v40 = vld [vmem:[%s5597_s28 + $0x40] ss:$8 sps:$4 sm:$0xff]   ;;  %v4437_v42 = vld [vmem:[%s5597_s28 + $0x50] ss:$8 sps:$4 sm:$0xff]  }
  0x4c   :  { %4364 = vmatprep.subr.bf16.mxu1 %v5210_v10  ;;  %4352 = vmatprep.subr.bf16.mxu0 %v5210_v10  ;;  %v598_v52 = vld [vmem:[%s5598_s26] sm:$0x3] }
  0x4d   :  { %v603_v54 = vrot.slane %v598_v52, %v5299_v51  ;;  %v607_v55 = vrot.slane %v598_v52, %v5304_v53  ;;  %v642_v58 = vld [vmem:[%s5599_s14] sm:$0x3]  ;;  %v4457_v52 = vld [vmem:[#allocation2 + $0x144] ss:$8 sps:$4 sm:$0xff]  }
  0x4e   :  { %v647_v1 = vrot.slane %v642_v58, %v5299_v51  ;;  %v651_v6 = vrot.slane %v642_v58, %v5304_v53  ;;  %v4461_v58 = vld [vmem:[#allocation2 + $0x160] ss:$8 sps:$4 sm:$0xff]  }
  0x4f   :  { %4365 = vmatpush3.bf16.msra.mxu1 %v5210_v10  ;;  %4353 = vmatpush3.bf16.msra.mxu0 %v5210_v10 }
  0x50   :  { %4366 = vmatprep.subr.bf16.mxu1 %v121_v13  ;;  %4354 = vmatprep.subr.bf16.mxu0 %v121_v13 }
  0x53   :  { %4367 = vmatpush3.bf16.msra.mxu1 %v121_v13  ;;  %4355 = vmatpush3.bf16.msra.mxu0 %v121_v13 }
  0x54   :  { %302 = vmatprep.subr.bf16.mxu0 %v4422_v14 }
  0x56   :  { %4369 = vmatmul.mubr.msk.bf16.vlgmr.msra.gmra.mrb[0].mxu1 %vm136_vm0, %v4417_v15  ;;  %4357 = vmatmul.mubr.msk.bf16.vlgmr.msra.gmra.mrb[0].mxu0 %vm136_vm0, %v4419_v16 }
  0x57   :  { %303 = vmatpush1.bf16.msra.mxu0 %v4420_v17  ;;  %334 = vmatprep.mubr.bf16.mxu0 %v5012_v20 }
  0x58   :  { %304 = vmatprep.subr.bf16.mxu0 %v4425_v18  ;;  %708 = vmatprep.mubr.bf16.mxu1 %v5012_v20 }
  0x5b   :  { %305 = vmatpush1.bf16.msra.mxu0 %v4423_v19 }
  0x5c   :  { %381 = vmatprep.subr.bf16.mxu0 %v4428_v21 }
 0x129   :  { %v4370_v22 = vpop.f32.mrb[0].mxu1  ;;  %v4358_v23 = vpop.f32.mrb[0].mxu0 }
 0x12a   :  { %v253_v24 = vpop.f32.mrb[1].mxu1  ;;  %v177_v25 = vpop.f32.mrb[1].mxu0 }
 0x12b   :  { %v4371_v26 = vpop.f32.mrb[2].mxu1  ;;  %v4359_v27 = vpop.f32.mrb[2].mxu0 }
 0x12c   :  { %v269_v28 = vpack.c.bf16 %v4371_v26, %v4370_v22  ;;  %v256_v29 = vpop.f32.mrb[3].mxu1  ;;  %v193_v31 = vpack.c.bf16 %v4359_v27, %v4358_v23  ;;  %v180_v32 = vpop.f32.mrb[3].mxu0 }
 0x12d   :  { %v268_v33 = vpack.c.bf16 %v256_v29, %v253_v24  ;;  %v192_v34 = vpack.c.bf16 %v180_v32, %v177_v25 }
 0x12f   :  { %3879 = vmatmul.mubr.msk.bf16.vlgmr.msra.gmra.mrb[4].mxu0 %vm295_vm1, %v268_v33 }
 0x130   :  { %382 = vmatpush1.bf16.msra.mxu0 %v4426_v30  ;;  %344 = vmatprep.mubr.bf16.mxu0 %v5012_v20 }
 0x131   :  { %383 = vmatprep.subr.bf16.mxu0 %v4431_v35 }
 0x134   :  { %384 = vmatpush1.bf16.msra.mxu0 %v4429_v36 }
 0x135   :  { %4372 = vmatprep.subr.bf16.mxu0 %v5186_v3 }
 0x137   :  { %3880 = vmatmul.mubr.msk.bf16.gmra.mrb[8].mxu0 %vm295_vm1, %v269_v28 }
 0x138   :  { %413 = vmatprep.mubr.bf16.mxu0 %v5012_v20 }
 0x13f   :  { %3885 = vmatmul.mubr.msk.bf16.vlgmr.msra.gmra.mrb[4].mxu0 %vm295_vm1, %v192_v34 }
 0x140   :  { %4373 = vmatpush3.bf16.msra.mxu0 %v5186_v3  ;;  %423 = vmatprep.mubr.bf16.mxu0 %v5012_v20 }
 0x141   :  { %4374 = vmatprep.subr.bf16.mxu0 %v5191_v5 }
 0x144   :  { %4375 = vmatpush3.bf16.msra.mxu0 %v5191_v5 }
 0x145   :  { %4376 = vmatprep.subr.bf16.mxu0 %v5210_v10 }
 0x147   :  { %3886 = vmatmul.mubr.msk.bf16.gmra.mrb[8].mxu0 %vm295_vm1, %v193_v31 }
 0x148   :  { %4377 = vmatpush3.bf16.msra.mxu0 %v5210_v10  ;;  %4380 = vmatprep.mubr.msk.bf16.mxu0 %vm136_vm0, %v4432_v37 }
 0x149   :  { %4378 = vmatprep.subr.bf16.mxu0 %v121_v13 }
 0x14c   :  { %4379 = vmatpush3.bf16.msra.mxu0 %v121_v13 }
 0x14d   :  { %537 = vmatprep.subr.bf16.mxu0 %v4436_v38 }
 0x14f   :  { %4381 = vmatmul.mubr.msk.bf16.vlgmr.msra.gmra.mrb[12].mxu0 %vm136_vm0, %v4433_v39 }
 0x150   :  { %538 = vmatpush1.bf16.msra.mxu0 %v4434_v40  ;;  %569 = vmatprep.mubr.bf16.mxu0 %v5012_v20  ;;  %v4440_v40 = vld [vmem:[%s5600_s24] sm:$0xff]  }
 0x151   :  { %539 = vmatprep.subr.bf16.mxu0 %v4439_v41  ;;  %v4442_v41 = vld [vmem:[%s5600_s24 + $0x10] sm:$0xff]  }
 0x154   :  { %540 = vmatpush1.bf16.msra.mxu0 %v4437_v42  ;;  %v4445_v42 = vld [vmem:[#allocation2 + $0x104] ss:$8 sps:$4 sm:$0xff]  }
 0x222   :  { %v4382_v43 = vpop.f32.mrb[12].mxu0 }
 0x223   :  { %v489_v44 = vpop.f32.mrb[13].mxu0 }
 0x224   :  { %v4383_v45 = vpop.f32.mrb[14].mxu0 }
 0x225   :  { %v505_v46 = vpack.c.bf16 %v4383_v45, %v4382_v43  ;;  %v492_v47 = vpop.f32.mrb[15].mxu0  ;;  %v4441_v43 = vld [vmem:[%s5600_s24 + $0x8] sm:$0xff]   ;;  %v4448_v45 = vld [vmem:[#allocation2 + $0x114] ss:$8 sps:$4 sm:$0xff]   ;;  %s3847_s24 = sshll.u32 %s5014_s1, 4  ;;  %s3848_s24 = int_to_ptr.vmem [resolvable:$true] %s3847_s24 }
 0x226   :  { %v504_v48 = vpack.c.bf16 %v492_v47, %v489_v44  ;;  %v4443_v44 = vld [vmem:[#allocation2 + $0x100] ss:$8 sps:$4 sm:$0xff]   ;;  %v4451_v47 = vld [vmem:[#allocation2 + $0x124] ss:$8 sps:$4 sm:$0xff]   ;;  %p4984_p11 = scmp.lt.s32.totalorder %s3848_s24, %s3848_s24 }
 0x228   :  { %3903 = vmatmul.mubr.msk.bf16.vlgmr.msra.gmra.mrb[4].mxu0 %vm295_vm1, %v504_v48  ;;  %v4449_v48 = vld [vmem:[#allocation2 + $0x120] ss:$8 sps:$4 sm:$0xff]  }
 0x229   :  { %579 = vmatprep.mubr.bf16.mxu0 %v5012_v20 }
 0x230   :  { %3904 = vmatmul.mubr.msk.bf16.gmra.mrb[8].mxu0 %vm295_vm1, %v505_v46  ;;  %v4446_v46 = vld [vmem:[#allocation2 + $0x110] ss:$8 sps:$4 sm:$0xff]  }
 0x231   :  { %1291 = vmatprep.mubr.bf16.mxu0 %v5012_v20 }
 0x2fb   :  { %v571_v56 = vpop.f32.mrb[4].mxu0 }
 0x2fc   :  { %v610_v57 = vadd.f32 %v603_v54, %v571_v56  ;;  %v573_v59 = vpop.f32.mrb[5].mxu0  ;;  %v4458_v56 = vld [vmem:[#allocation2 + $0x150] ss:$8 sps:$4 sm:$0xff]  }
 0x2fd   :  { %v611_v60 = vadd.f32 %v607_v55, %v573_v59  ;;  %v575_v61 = vpop.f32.mrb[6].mxu0  ;;  %v4466_v59 = vld [vmem:[#allocation2 + $0x174] ss:$8 sps:$4 sm:$0xff]  }
 0x2fe   :  { %vm618_vm2 = vcmp.gt.f32.partialorder %v610_v57, 0.0  ;;  %v626_v62 = vmul.f32 0.2, %v610_v57  ;;  %v612_v63 = vadd.f32 %v603_v54, %v575_v61  ;;  %v577_v0 = vpop.f32.mrb[7].mxu0  ;;  %v4469_v61 = vld [vmem:[#allocation2 + $0x184] ss:$8 sps:$4 sm:$0xff]  }
 0x2ff   :  { %vm619_vm3 = vcmp.gt.f32.partialorder %v611_v60, 0.0  ;;  %v627_v2 = vmul.f32 0.2, %v611_v60  ;;  %v613_v3 = vadd.f32 %v607_v55, %v577_v0  ;;  %v4470_v0 = vld [vmem:[#allocation2 + $0x190] ss:$8 sps:$4 sm:$0xff]  }
 0x300   :  { %v634_v4 = vsel %vm618_vm2, %v610_v57, %v626_v62  ;;  %vm620_vm4 = vcmp.gt.f32.partialorder %v612_v63, 0.0  ;;  %v628_v5 = vmul.f32 0.2, %v612_v63  ;;  %v4463_v57 = vld [vmem:[#allocation2 + $0x164] ss:$8 sps:$4 sm:$0xff]   ;;  %vm2474_vm2 = vcmask 64512  }
 0x301   :  { %v635_v7 = vsel %vm619_vm3, %v611_v60, %v627_v2  ;;  %vm621_vm5 = vcmp.gt.f32.partialorder %v613_v3, 0.0  ;;  %v629_v8 = vmul.f32 0.2, %v613_v3  ;;  %v654_v10 = vadd.f32 %v647_v1, %v634_v4  ;;  %v4464_v60 = vld [vmem:[#allocation2 + $0x170] ss:$8 sps:$4 sm:$0xff]  }
 0x302   :  { %v636_v9 = vsel %vm620_vm4, %v612_v63, %v628_v5  ;;  %v655_v16 = vadd.f32 %v651_v6, %v635_v7  ;;  %v4467_v62 = vld [vmem:[#allocation2 + $0x180] ss:$8 sps:$4 sm:$0xff]   ;;  %v4472_v63 = vld [vmem:[#allocation2 + $0x194] ss:$8 sps:$4 sm:$0xff]   ;;  %v4476_v4 = vld [vmem:[#allocation2 + $0x1b0] ss:$8 sps:$4 sm:$0xff]  }
 0x303   :  { %v656_v11 = vadd.f32 %v647_v1, %v636_v9  ;;  %v637_v12 = vsel %vm621_vm5, %v613_v3, %v629_v8  ;;  %v581_v13 = vpop.f32.mrb[8].mxu0  ;;  %v4473_v2 = vld [vmem:[#allocation2 + $0x1a0] ss:$8 sps:$4 sm:$0xff]   ;;  %v4478_v3 = vld [vmem:[#allocation2 + $0x1b4] ss:$8 sps:$4 sm:$0xff]   ;;  %vm3368_vm5 = vcmask 1041408  }
 0x304   :  { %v614_v14 = vadd.f32 %v603_v54, %v581_v13  ;;  %v583_v15 = vpop.f32.mrb[9].mxu0  ;;  %v657_v17 = vadd.f32 %v651_v6, %v637_v12  ;;  %v4481_v5 = vld [vmem:[#allocation2 + $0x1c4] ss:$8 sps:$4 sm:$0xff]   ;;  %v4484_v7 = vld [vmem:[#allocation2 + $0x1d4] ss:$8 sps:$4 sm:$0xff]  }
 0x305   :  { %v615_v18 = vadd.f32 %v607_v55, %v583_v15  ;;  %v585_v19 = vpop.f32.mrb[10].mxu0  ;;  %v662_v21 = vpack.c.bf16 %v656_v11, %v654_v10  ;;  %v4482_v8 = vld [vmem:[#allocation2 + $0x1d0] ss:$8 sps:$4 sm:$0xff]   ;;  %v4485_v9 = vld [vmem:[#allocation2 + $0x1e0] ss:$8 sps:$4 sm:$0xff]  }
 0x306   :  { %vm622_vm6 = vcmp.gt.f32.partialorder %v614_v14, 0.0  ;;  %v630_v22 = vmul.f32 0.2, %v614_v14  ;;  %v616_v23 = vadd.f32 %v603_v54, %v585_v19  ;;  %v587_v24 = vpop.f32.mrb[11].mxu0  ;;  %v663_v25 = vpack.c.bf16 %v657_v17, %v655_v16  ;;  %v4455_v54 = vld [vmem:[#allocation2 + $0x140] ss:$8 sps:$4 sm:$0xff]  }
 0x307   :  { %vm623_vm7 = vcmp.gt.f32.partialorder %v615_v18, 0.0  ;;  %v631_v26 = vmul.f32 0.2, %v615_v18  ;;  %v617_v27 = vadd.f32 %v607_v55, %v587_v24  ;;  %v4460_v55 = vld [vmem:[#allocation2 + $0x154] ss:$8 sps:$4 sm:$0xff]  }
 0x308   :  { %v638_v28 = vsel %vm622_vm6, %v614_v14, %v630_v22  ;;  %vm624_vm8 = vcmp.gt.f32.partialorder %v616_v23, 0.0  ;;  %v632_v29 = vmul.f32 0.2, %v616_v23  ;;  %676 = vmatprep.subr.bf16.mxu1 %v663_v25  ;;  %1259 = vmatprep.subr.bf16.mxu0 %v663_v25  ;;  %v4487_v10 = vld [vmem:[#allocation2 + $0x1e4] ss:$8 sps:$4 sm:$0xff]   ;;  %vm3364_vm6 = vcmask 31744  }
 0x309   :  { %v639_v30 = vsel %vm623_vm7, %v615_v18, %v631_v26  ;;  %vm625_vm9 = vcmp.gt.f32.partialorder %v617_v27, 0.0  ;;  %v633_v31 = vmul.f32 0.2, %v617_v27  ;;  %677 = vmatpush1.bf16.msra.mxu1 %v662_v21  ;;  %1260 = vmatpush1.bf16.msra.mxu0 %v662_v21  ;;  %v658_v33 = vadd.f32 %v647_v1, %v638_v28  ;;  %v4490_v11 = vld [vmem:[#allocation2 + $0x1f4] ss:$8 sps:$4 sm:$0xff]  }
 0x30a   :  { %v640_v32 = vsel %vm624_vm8, %v616_v23, %v632_v29  ;;  %v659_v36 = vadd.f32 %v651_v6, %v639_v30  ;;  %v4488_v12 = vld [vmem:[#allocation2 + $0x1f0] ss:$8 sps:$4 sm:$0xff]   ;;  %v4493_v13 = vld [vmem:[#allocation2 + $0x4] ss:$8 sps:$4 sm:$0xff]   ;;  %vm3817_vm7 = vcmask 82952   ;;  %vm3815_vm8 = vcmask 1024  }
 0x30b   :  { %v660_v34 = vadd.f32 %v647_v1, %v640_v32  ;;  %v641_v35 = vsel %vm625_vm9, %v617_v27, %v633_v31  ;;  %v4475_v1 = vld [vmem:[#allocation2 + $0x1a4] ss:$8 sps:$4 sm:$0xff]   ;;  %vm3828_vm9 = vcmask 74752  }
 0x30c   :  { %v661_v37 = vadd.f32 %v651_v6, %v641_v35  ;;  %v4479_v6 = vld [vmem:[#allocation2 + $0x1c0] ss:$8 sps:$4 sm:$0xff]   ;;  %v4494_v35 = vld [vmem:[#allocation2 + $0x10] ss:$8 sps:$4 sm:$0xff]  }
 0x30d   :  { %v664_v38 = vpack.c.bf16 %v660_v34, %v658_v33  ;;  %v4491_v33 = vld [vmem:[#allocation2] ss:$8 sps:$4 sm:$0xff]   ;;  %v4496_v34 = vld [vmem:[#allocation2 + $0x14] ss:$8 sps:$4 sm:$0xff]  }
 0x30e   :  { %v665_v39 = vpack.c.bf16 %v661_v37, %v659_v36  ;;  %v4499_v36 = vld [vmem:[#allocation2 + $0x24] ss:$8 sps:$4 sm:$0xff]   ;;  %v4497_v37 = vld [vmem:[#allocation2 + $0x20] ss:$8 sps:$4 sm:$0xff]  }
 0x310   :  { %678 = vmatprep.subr.bf16.mxu1 %v665_v39  ;;  %1261 = vmatprep.subr.bf16.mxu0 %v665_v39 }
 0x311   :  { %679 = vmatpush1.bf16.msra.mxu1 %v664_v38  ;;  %1262 = vmatpush1.bf16.msra.mxu0 %v664_v38 }
 0x312   :  { %764 = vmatprep.subr.bf16.mxu1 %v663_v25 }
 0x314   :  { %3906 = vmatmul.mubr.msk.bf16.vlgmr.msra.gmra.mrb[4].mxu1 %vm295_vm1, %v4440_v40  ;;  %3978 = vmatmul.mubr.msk.bf16.vlgmr.msra.gmra.mrb[16].mxu0 %vm295_vm1, %v4442_v41  ;;  %v4505_v40 = vld [vmem:[#allocation2 + $0x44] ss:$8 sps:$4 sm:$0xff]   ;;  %v4503_v41 = vld [vmem:[#allocation2 + $0x40] ss:$8 sps:$4 sm:$0xff]  }
 0x315   :  { %765 = vmatpush1.bf16.msra.mxu1 %v662_v21  ;;  %796 = vmatprep.mubr.bf16.mxu1 %v5012_v20 }
 0x316   :  { %766 = vmatprep.subr.bf16.mxu1 %v665_v39  ;;  %1627 = vmatprep.mubr.bf16.mxu0 %v5012_v20  ;;  %v4500_v39 = vld [vmem:[#allocation2 + $0x30] ss:$8 sps:$4 sm:$0xff]  }
 0x319   :  { %767 = vmatpush1.bf16.msra.mxu1 %v664_v38  ;;  %v4502_v38 = vld [vmem:[#allocation2 + $0x34] ss:$8 sps:$4 sm:$0xff]  }
 0x31a   :  { %1002 = vmatprep.subr.bf16.mxu1 %v4445_v42  ;;  %v4508_v42 = vld [vmem:[#allocation2 + $0x54] ss:$8 sps:$4 sm:$0xff]  }
 0x31c   :  { %3910 = vmatmul.mubr.msk.bf16.vlgmr.msra.gmra.mrb[8].mxu1 %vm295_vm1, %v4441_v43  ;;  %v4506_v43 = vld [vmem:[#allocation2 + $0x50] ss:$8 sps:$4 sm:$0xff]   ;;  %vm2478_vm1 = vcmask 1043456  }
 0x31d   :  { %1003 = vmatpush1.bf16.msra.mxu1 %v4443_v44  ;;  %v4511_v44 = vld [vmem:[#allocation2 + $0x64] ss:$8 sps:$4 sm:$0xff]  }
 0x31e   :  { %1004 = vmatprep.subr.bf16.mxu1 %v4448_v45  ;;  %v4509_v45 = vld [vmem:[#allocation2 + $0x60] ss:$8 sps:$4 sm:$0xff]  }
 0x321   :  { %1005 = vmatpush1.bf16.msra.mxu1 %v4446_v46  ;;  %v4514_v46 = vld [vmem:[#allocation2 + $0x74] ss:$8 sps:$4 sm:$0xff]  }
 0x322   :  { %1006 = vmatprep.subr.bf16.mxu1 %v4451_v47  ;;  %v4512_v47 = vld [vmem:[#allocation2 + $0x70] ss:$8 sps:$4 sm:$0xff]  }
 0x325   :  { %1007 = vmatpush1.bf16.msra.mxu1 %v4449_v48  ;;  %v4517_v48 = vld [vmem:[#allocation2 + $0x84] ss:$8 sps:$4 sm:$0xff]  }
 0x326   :  { %1008 = vmatprep.subr.bf16.mxu1 %v4454_v49  ;;  %v4515_v49 = vld [vmem:[#allocation2 + $0x80] ss:$8 sps:$4 sm:$0xff]  }
 0x329   :  { %1009 = vmatpush1.bf16.msra.mxu1 %v4452_v50  ;;  %v4520_v50 = vld [vmem:[#allocation2 + $0x94] ss:$8 sps:$4 sm:$0xff]  }
 0x32a   :  { %1010 = vmatprep.subr.bf16.mxu1 %v4457_v52  ;;  %v4518_v52 = vld [vmem:[#allocation2 + $0x90] ss:$8 sps:$4 sm:$0xff]  }
 0x32d   :  { %1011 = vmatpush1.bf16.msra.mxu1 %v4455_v54  ;;  %v4523_v54 = vld [vmem:[#allocation2 + $0xa4] ss:$8 sps:$4 sm:$0xff]  }
 0x32e   :  { %1012 = vmatprep.subr.bf16.mxu1 %v4460_v55  ;;  %v4521_v55 = vld [vmem:[#allocation2 + $0xa0] ss:$8 sps:$4 sm:$0xff]  }
 0x331   :  { %1013 = vmatpush1.bf16.msra.mxu1 %v4458_v56  ;;  %v4526_v56 = vld [vmem:[#allocation2 + $0xb4] ss:$8 sps:$4 sm:$0xff]  }
 0x332   :  { %1014 = vmatprep.subr.bf16.mxu1 %v4463_v57  ;;  %v4524_v57 = vld [vmem:[#allocation2 + $0xb0] ss:$8 sps:$4 sm:$0xff]  }
 0x335   :  { %1015 = vmatpush1.bf16.msra.mxu1 %v4461_v58  ;;  %v4529_v58 = vld [vmem:[#allocation2 + $0xc4] ss:$8 sps:$4 sm:$0xff]  }
 0x336   :  { %1016 = vmatprep.subr.bf16.mxu1 %v4466_v59  ;;  %v4527_v59 = vld [vmem:[#allocation2 + $0xc0] ss:$8 sps:$4 sm:$0xff]  }
 0x339   :  { %1017 = vmatpush1.bf16.msra.mxu1 %v4464_v60  ;;  %v4532_v60 = vld [vmem:[#allocation2 + $0xd4] ss:$8 sps:$4 sm:$0xff]  }
 0x33a   :  { %1018 = vmatprep.subr.bf16.mxu1 %v4469_v61  ;;  %v4530_v61 = vld [vmem:[#allocation2 + $0xd0] ss:$8 sps:$4 sm:$0xff]  }
 0x33d   :  { %1019 = vmatpush1.bf16.msra.mxu1 %v4467_v62  ;;  %v4535_v62 = vld [vmem:[#allocation2 + $0xe4] ss:$8 sps:$4 sm:$0xff]  }
 0x33e   :  { %1020 = vmatprep.subr.bf16.mxu1 %v4472_v63  ;;  %v4533_v63 = vld [vmem:[#allocation2 + $0xe0] ss:$8 sps:$4 sm:$0xff]  }
 0x341   :  { %1021 = vmatpush1.bf16.msra.mxu1 %v4470_v0  ;;  %v4538_v0 = vld [vmem:[#allocation2 + $0xf4] ss:$8 sps:$4 sm:$0xff]  }
 0x342   :  { %1022 = vmatprep.subr.bf16.mxu1 %v4475_v1  ;;  %v4536_v1 = vld [vmem:[#allocation2 + $0xf0] ss:$8 sps:$4 sm:$0xff]  }
 0x345   :  { %1023 = vmatpush1.bf16.msra.mxu1 %v4473_v2  ;;  %v4541_v2 = vld [vmem:[#allocation2 + $0x204] ss:$8 sps:$4 sm:$0xff]  }
 0x346   :  { %1024 = vmatprep.subr.bf16.mxu1 %v4478_v3  ;;  %v4539_v3 = vld [vmem:[#allocation2 + $0x200] ss:$8 sps:$4 sm:$0xff]  }
 0x349   :  { %1025 = vmatpush1.bf16.msra.mxu1 %v4476_v4  ;;  %v4544_v4 = vld [vmem:[#allocation2 + $0x214] ss:$8 sps:$4 sm:$0xff]  }
 0x34a   :  { %1026 = vmatprep.subr.bf16.mxu1 %v4481_v5  ;;  %v4542_v5 = vld [vmem:[#allocation2 + $0x210] ss:$8 sps:$4 sm:$0xff]  }
 0x34d   :  { %1027 = vmatpush1.bf16.msra.mxu1 %v4479_v6  ;;  %v4547_v6 = vld [vmem:[#allocation2 + $0x224] ss:$8 sps:$4 sm:$0xff]  }
 0x34e   :  { %1028 = vmatprep.subr.bf16.mxu1 %v4484_v7  ;;  %v4545_v7 = vld [vmem:[#allocation2 + $0x220] ss:$8 sps:$4 sm:$0xff]  }
 0x351   :  { %1029 = vmatpush1.bf16.msra.mxu1 %v4482_v8  ;;  %v4550_v8 = vld [vmem:[#allocation2 + $0x234] ss:$8 sps:$4 sm:$0xff]  }
 0x352   :  { %1030 = vmatprep.subr.bf16.mxu1 %v4487_v10  ;;  %v4553_v10 = vld [vmem:[#allocation2 + $0x244] ss:$8 sps:$4 sm:$0xff]  }
 0x355   :  { %1031 = vmatpush1.bf16.msra.mxu1 %v4485_v9  ;;  %v4548_v9 = vld [vmem:[#allocation2 + $0x230] ss:$8 sps:$4 sm:$0xff]  }
 0x356   :  { %1032 = vmatprep.subr.bf16.mxu1 %v4490_v11  ;;  %v4551_v11 = vld [vmem:[#allocation2 + $0x240] ss:$8 sps:$4 sm:$0xff]  }
 0x359   :  { %1033 = vmatpush1.bf16.msra.mxu1 %v4488_v12  ;;  %v4556_v12 = vld [vmem:[#allocation2 + $0x254] ss:$8 sps:$4 sm:$0xff]  }
 0x35a   :  { %1205 = vmatprep.subr.bf16.mxu1 %v4493_v13  ;;  %v4554_v13 = vld [vmem:[#allocation2 + $0x250] ss:$8 sps:$4 sm:$0xff]  }
 0x3e7   :  { %v5327_v14 = vpop.f32.mrb[4].mxu1  ;;  %v5333_v21 = vpop.f32.mrb[16].mxu0 }
 0x3e8   :  { %v712_v15 = vpop.f32.mrb[5].mxu1  ;;  %v5335_v22 = vpop.f32.mrb[17].mxu0 }
 0x3e9   :  { %v5329_v16 = vpop.f32.mrb[6].mxu1  ;;  %v5337_v23 = vpop.f32.mrb[18].mxu0 }
 0x3ea   :  { %v719_v17 = vpack.c.bf16 %v5329_v16, %v5327_v14  ;;  %v716_v18 = vpop.f32.mrb[7].mxu1  ;;  %v1302_v24 = vpack.c.bf16 %v5337_v23, %v5333_v21  ;;  %v5341_v25 = vpop.f32.mrb[19].mxu0  ;;  %v4559_v14 = vld [vmem:[#allocation2 + $0x264] ss:$8 sps:$4 sm:$0xff]   ;;  %v4562_v16 = vld [vmem:[#allocation2 + $0x274] ss:$8 sps:$4 sm:$0xff]  }
 0x3eb   :  { %v720_v19 = vpack.c.bf16 %v716_v18, %v712_v15  ;;  %v1303_v27 = vpack.c.bf16 %v5341_v25, %v5335_v22  ;;  %v4557_v15 = vld [vmem:[#allocation2 + $0x260] ss:$8 sps:$4 sm:$0xff]   ;;  %v4565_v18 = vld [vmem:[#allocation2 + $0x284] ss:$8 sps:$4 sm:$0xff]   ;;  %v4568_v22 = vld [vmem:[#allocation2 + $0x294] ss:$8 sps:$4 sm:$0xff]  }
 0x3ec   :  { %v4566_v25 = vld [vmem:[#allocation2 + $0x290] ss:$8 sps:$4 sm:$0xff]  }
 0x3ef   :  { %v798_v26 = vpop.f32.mrb[8].mxu1 }
 0x3f0   :  { %v800_v28 = vpop.f32.mrb[9].mxu1 }
 0x3f1   :  { %v802_v29 = vpop.f32.mrb[10].mxu1 }
 0x3f2   :  { %v807_v30 = vpack.c.bf16 %v802_v29, %v798_v26  ;;  %v804_v31 = vpop.f32.mrb[11].mxu1  ;;  %v4571_v26 = vld [vmem:[#allocation2 + $0x2a4] ss:$8 sps:$4 sm:$0xff]   ;;  %v4572_v29 = vld [vmem:[#allocation2 + $0x2b0] ss:$8 sps:$4 sm:$0xff]  }
 0x3f3   :  { %v808_v32 = vpack.c.bf16 %v804_v31, %v800_v28  ;;  %v4574_v28 = vld [vmem:[#allocation2 + $0x2b4] ss:$8 sps:$4 sm:$0xff]   ;;  %v4575_v31 = vld [vmem:[#allocation2 + $0x2c0] ss:$8 sps:$4 sm:$0xff]  }
 0x3f5   :  { %1034 = vmatprep.mubr.bf16.mxu1 %v808_v32  ;;  %v4580_v32 = vld [vmem:[#allocation2 + $0x2d4] ss:$8 sps:$4 sm:$0xff]  }
 0x3f6   :  { %1035 = vmatmul.mubr.bf16.vlgmr.msra.gmra.mrb[12].mxu1 %v807_v30  ;;  %v4577_v30 = vld [vmem:[#allocation2 + $0x2c4] ss:$8 sps:$4 sm:$0xff]  }
 0x3f7   :  { %1206 = vmatpush1.bf16.msra.mxu1 %v4491_v33  ;;  %1237 = vmatprep.mubr.bf16.mxu1 %v720_v19  ;;  %v4563_v19 = vld [vmem:[#allocation2 + $0x280] ss:$8 sps:$4 sm:$0xff]   ;;  %v4578_v33 = vld [vmem:[#allocation2 + $0x2d0] ss:$8 sps:$4 sm:$0xff]  }
 0x3f8   :  { %1207 = vmatprep.subr.bf16.mxu1 %v4496_v34  ;;  %v4583_v34 = vld [vmem:[#allocation2 + $0x2e4] ss:$8 sps:$4 sm:$0xff]  }
 0x3fb   :  { %1208 = vmatpush1.bf16.msra.mxu1 %v4494_v35  ;;  %v4581_v35 = vld [vmem:[#allocation2 + $0x2e0] ss:$8 sps:$4 sm:$0xff]  }
 0x3fc   :  { %1209 = vmatprep.subr.bf16.mxu1 %v4499_v36  ;;  %v4586_v36 = vld [vmem:[#allocation2 + $0x2f4] ss:$8 sps:$4 sm:$0xff]  }
 0x3ff   :  { %1210 = vmatpush1.bf16.msra.mxu1 %v4497_v37  ;;  %v4584_v37 = vld [vmem:[#allocation2 + $0x2f0] ss:$8 sps:$4 sm:$0xff]  }
 0x400   :  { %1211 = vmatprep.subr.bf16.mxu1 %v4502_v38  ;;  %v1544_v38 = vld [vmem:[%s5570_s7] sm:$0x3] }
 0x403   :  { %1212 = vmatpush1.bf16.msra.mxu1 %v4500_v39  ;;  %v1549_v39 = vrot.slane %v1544_v38, %v5299_v51 }
 0x404   :  { %1213 = vmatprep.subr.bf16.mxu1 %v4505_v40  ;;  %v1553_v40 = vrot.slane %v1544_v38, %v5304_v53  ;;  %v4632_v38 = vld [vmem:[#allocation5 + $0x1f0] ss:$8 sps:$4 sm:$0xff]  }
 0x407   :  { %1214 = vmatpush1.bf16.msra.mxu1 %v4503_v41 }
 0x408   :  { %1215 = vmatprep.subr.bf16.mxu1 %v4508_v42 }
 0x40b   :  { %1216 = vmatpush1.bf16.msra.mxu1 %v4506_v43  ;;  %v1572_v43 = vld [vmem:[%s5571_s8] sm:$0x3] }
 0x40c   :  { %1217 = vmatprep.subr.bf16.mxu1 %v4511_v44 }
 0x40f   :  { %1218 = vmatpush1.bf16.msra.mxu1 %v4509_v45 }
 0x410   :  { %1219 = vmatprep.subr.bf16.mxu1 %v4514_v46 }
 0x413   :  { %1220 = vmatpush1.bf16.msra.mxu1 %v4512_v47  ;;  %v1577_v47 = vrot.slane %v1572_v43, %v5299_v51 }
 0x414   :  { %1221 = vmatprep.subr.bf16.mxu1 %v4517_v48 }
 0x417   :  { %1222 = vmatpush1.bf16.msra.mxu1 %v4515_v49 }
 0x418   :  { %1223 = vmatprep.subr.bf16.mxu1 %v4520_v50 }
 0x41b   :  { %1224 = vmatpush1.bf16.msra.mxu1 %v4518_v52 }
 0x41c   :  { %1225 = vmatprep.subr.bf16.mxu1 %v4523_v54  ;;  %v1581_v54 = vrot.slane %v1572_v43, %v5304_v53 }
 0x41f   :  { %1226 = vmatpush1.bf16.msra.mxu1 %v4521_v55 }
 0x420   :  { %1227 = vmatprep.subr.bf16.mxu1 %v4526_v56 }
 0x423   :  { %1228 = vmatpush1.bf16.msra.mxu1 %v4524_v57 }
 0x424   :  { %1229 = vmatprep.subr.bf16.mxu1 %v4529_v58 }
 0x427   :  { %1230 = vmatpush1.bf16.msra.mxu1 %v4527_v59 }
 0x428   :  { %1231 = vmatprep.subr.bf16.mxu1 %v4532_v60 }
 0x42b   :  { %1232 = vmatpush1.bf16.msra.mxu1 %v4530_v61 }
 0x42c   :  { %1233 = vmatprep.subr.bf16.mxu1 %v4535_v62 }
 0x42f   :  { %1234 = vmatpush1.bf16.msra.mxu1 %v4533_v63 }
 0x430   :  { %1235 = vmatprep.subr.bf16.mxu1 %v4538_v0 }
 0x433   :  { %1236 = vmatpush1.bf16.msra.mxu1 %v4536_v1  ;;  %v1590_v1 = vld [vmem:[%s5572_s9] sm:$0xf] }
 0x434   :  { %1497 = vmatprep.subr.bf16.mxu1 %v4541_v2  ;;  %v4589_v2 = vld [vmem:[#allocation5 + $0x104] ss:$8 sps:$4 sm:$0xff]  }
 0x436   :  { %1238 = vmatmul.mubr.bf16.vlgmr.msra.gmra.mrb[12].mxu1 %v719_v17  ;;  %v4560_v17 = vld [vmem:[#allocation2 + $0x270] ss:$8 sps:$4 sm:$0xff]  }
 0x437   :  { %1498 = vmatpush1.bf16.msra.mxu1 %v4539_v3  ;;  %1529 = vmatprep.mubr.bf16.mxu1 %v1303_v27  ;;  %v4569_v27 = vld [vmem:[#allocation2 + $0x2a0] ss:$8 sps:$4 sm:$0xff]   ;;  %v4012_v3 = vld [vmem:[%s5572_s9 + $0x4] sm:$0xf] }
 0x438   :  { %1499 = vmatprep.subr.bf16.mxu1 %v4544_v4  ;;  %v4587_v4 = vld [vmem:[#allocation5 + $0x100] ss:$8 sps:$4 sm:$0xff]  }
 0x43b   :  { %1500 = vmatpush1.bf16.msra.mxu1 %v4542_v5  ;;  %v4592_v5 = vld [vmem:[#allocation5 + $0x114] ss:$8 sps:$4 sm:$0xff]  }
 0x43c   :  { %1501 = vmatprep.subr.bf16.mxu1 %v4547_v6  ;;  %v4590_v6 = vld [vmem:[#allocation5 + $0x110] ss:$8 sps:$4 sm:$0xff]  }
 0x43f   :  { %1502 = vmatpush1.bf16.msra.mxu1 %v4545_v7  ;;  %v4595_v7 = vld [vmem:[#allocation5 + $0x124] ss:$8 sps:$4 sm:$0xff]  }
 0x440   :  { %1503 = vmatprep.subr.bf16.mxu1 %v4550_v8  ;;  %v4593_v8 = vld [vmem:[#allocation5 + $0x120] ss:$8 sps:$4 sm:$0xff]  }
 0x443   :  { %1504 = vmatpush1.bf16.msra.mxu1 %v4548_v9  ;;  %v4598_v9 = vld [vmem:[#allocation5 + $0x134] ss:$8 sps:$4 sm:$0xff]  }
 0x444   :  { %1505 = vmatprep.subr.bf16.mxu1 %v4553_v10  ;;  %v4596_v10 = vld [vmem:[#allocation5 + $0x130] ss:$8 sps:$4 sm:$0xff]  }
 0x447   :  { %1506 = vmatpush1.bf16.msra.mxu1 %v4551_v11  ;;  %v4601_v11 = vld [vmem:[#allocation5 + $0x144] ss:$8 sps:$4 sm:$0xff]  }
 0x448   :  { %1507 = vmatprep.subr.bf16.mxu1 %v4556_v12  ;;  %v4599_v12 = vld [vmem:[#allocation5 + $0x140] ss:$8 sps:$4 sm:$0xff]  }
 0x44b   :  { %1508 = vmatpush1.bf16.msra.mxu1 %v4554_v13  ;;  %v4604_v13 = vld [vmem:[#allocation5 + $0x154] ss:$8 sps:$4 sm:$0xff]  }
 0x44c   :  { %1509 = vmatprep.subr.bf16.mxu1 %v4559_v14  ;;  %v4602_v14 = vld [vmem:[#allocation5 + $0x150] ss:$8 sps:$4 sm:$0xff]  }
 0x44f   :  { %1510 = vmatpush1.bf16.msra.mxu1 %v4557_v15  ;;  %v4607_v15 = vld [vmem:[#allocation5 + $0x164] ss:$8 sps:$4 sm:$0xff]  }
 0x450   :  { %1511 = vmatprep.subr.bf16.mxu1 %v4562_v16  ;;  %v4605_v16 = vld [vmem:[#allocation5 + $0x160] ss:$8 sps:$4 sm:$0xff]  }
 0x453   :  { %1512 = vmatpush1.bf16.msra.mxu1 %v4560_v17  ;;  %v4610_v17 = vld [vmem:[#allocation5 + $0x174] ss:$8 sps:$4 sm:$0xff]  }
 0x454   :  { %1513 = vmatprep.subr.bf16.mxu1 %v4565_v18  ;;  %v4608_v18 = vld [vmem:[#allocation5 + $0x170] ss:$8 sps:$4 sm:$0xff]  }
 0x457   :  { %1514 = vmatpush1.bf16.msra.mxu1 %v4563_v19  ;;  %v4613_v19 = vld [vmem:[#allocation5 + $0x184] ss:$8 sps:$4 sm:$0xff]  }
 0x458   :  { %1515 = vmatprep.subr.bf16.mxu1 %v4568_v22  ;;  %v4611_v22 = vld [vmem:[#allocation5 + $0x180] ss:$8 sps:$4 sm:$0xff]  }
 0x45b   :  { %1516 = vmatpush1.bf16.msra.mxu1 %v4566_v25  ;;  %v4616_v25 = vld [vmem:[#allocation5 + $0x194] ss:$8 sps:$4 sm:$0xff]  }
 0x45c   :  { %1517 = vmatprep.subr.bf16.mxu1 %v4571_v26  ;;  %v4614_v26 = vld [vmem:[#allocation5 + $0x190] ss:$8 sps:$4 sm:$0xff]  }
 0x45f   :  { %1518 = vmatpush1.bf16.msra.mxu1 %v4569_v27  ;;  %v4619_v27 = vld [vmem:[#allocation5 + $0x1a4] ss:$8 sps:$4 sm:$0xff]  }
 0x460   :  { %1519 = vmatprep.subr.bf16.mxu1 %v4574_v28  ;;  %v4617_v28 = vld [vmem:[#allocation5 + $0x1a0] ss:$8 sps:$4 sm:$0xff]  }
 0x463   :  { %1520 = vmatpush1.bf16.msra.mxu1 %v4572_v29  ;;  %v4622_v29 = vld [vmem:[#allocation5 + $0x1b4] ss:$8 sps:$4 sm:$0xff]  }
 0x464   :  { %1521 = vmatprep.subr.bf16.mxu1 %v4577_v30  ;;  %v4620_v30 = vld [vmem:[#allocation5 + $0x1b0] ss:$8 sps:$4 sm:$0xff]  }
 0x467   :  { %1522 = vmatpush1.bf16.msra.mxu1 %v4575_v31  ;;  %v4625_v31 = vld [vmem:[#allocation5 + $0x1c4] ss:$8 sps:$4 sm:$0xff]  }
 0x468   :  { %1523 = vmatprep.subr.bf16.mxu1 %v4580_v32  ;;  %v4623_v32 = vld [vmem:[#allocation5 + $0x1c0] ss:$8 sps:$4 sm:$0xff]  }
 0x46b   :  { %1524 = vmatpush1.bf16.msra.mxu1 %v4578_v33  ;;  %v4628_v33 = vld [vmem:[#allocation5 + $0x1d4] ss:$8 sps:$4 sm:$0xff]  }
 0x46c   :  { %1525 = vmatprep.subr.bf16.mxu1 %v4583_v34  ;;  %v4626_v34 = vld [vmem:[#allocation5 + $0x1d0] ss:$8 sps:$4 sm:$0xff]  }
 0x46f   :  { %1526 = vmatpush1.bf16.msra.mxu1 %v4581_v35  ;;  %v4631_v35 = vld [vmem:[#allocation5 + $0x1e4] ss:$8 sps:$4 sm:$0xff]  }
 0x470   :  { %1527 = vmatprep.subr.bf16.mxu1 %v4586_v36  ;;  %v4629_v36 = vld [vmem:[#allocation5 + $0x1e0] ss:$8 sps:$4 sm:$0xff]  }
 0x473   :  { %1528 = vmatpush1.bf16.msra.mxu1 %v4584_v37  ;;  %v4634_v37 = vld [vmem:[#allocation5 + $0x1f4] ss:$8 sps:$4 sm:$0xff]  }
 0x476   :  { %1530 = vmatmul.mubr.bf16.vlgmr.msra.gmra.mrb[12].mxu1 %v1302_v24 }
 0x477   :  { %2517 = vmatprep.mubr.bf16.mxu1 %v5012_v20 }
 0x549   :  { %v1531_v41 = vpop.f32.mrb[12].mxu1 }
 0x54a   :  { %v1556_v42 = vadd.f32 %v1549_v39, %v1531_v41  ;;  %v1533_v44 = vpop.f32.mrb[13].mxu1 }
 0x54b   :  { %v1557_v45 = vadd.f32 %v1553_v40, %v1533_v44  ;;  %v1535_v21 = vpop.f32.mrb[14].mxu1 }
 0x54c   :  { %vm1560_vm10 = vcmp.gt.f32.partialorder %v1556_v42, 0.0  ;;  %v1564_v23 = vmul.f32 0.2, %v1556_v42  ;;  %v1558_v24 = vadd.f32 %v1549_v39, %v1535_v21  ;;  %v1537_v46 = vpop.f32.mrb[15].mxu1  ;;  %v4637_v39 = vld [vmem:[#allocation5 + $0x4] ss:$8 sps:$4 sm:$0xff]  }
 0x54d   :  { %vm1561_vm11 = vcmp.gt.f32.partialorder %v1557_v45, 0.0  ;;  %v1565_v48 = vmul.f32 0.2, %v1557_v45  ;;  %v1559_v49 = vadd.f32 %v1553_v40, %v1537_v46 }
 0x54e   :  { %v1568_v50 = vsel %vm1560_vm10, %v1556_v42, %v1564_v23  ;;  %vm1562_vm12 = vcmp.gt.f32.partialorder %v1558_v24, 0.0  ;;  %v1566_v52 = vmul.f32 0.2, %v1558_v24 }
 0x54f   :  { %v1569_v55 = vsel %vm1561_vm11, %v1557_v45, %v1565_v48  ;;  %vm1563_vm13 = vcmp.gt.f32.partialorder %v1559_v49, 0.0  ;;  %v1567_v56 = vmul.f32 0.2, %v1559_v49  ;;  %v1584_v58 = vadd.f32 %v1577_v47, %v1568_v50  ;;  %v4640_v48 = vld [vmem:[#allocation5 + $0x14] ss:$8 sps:$4 sm:$0xff]  }
 0x550   :  { %v1570_v57 = vsel %vm1562_vm12, %v1558_v24, %v1566_v52  ;;  %v1585_v61 = vadd.f32 %v1581_v54, %v1569_v55  ;;  %v4635_v24 = vld [vmem:[#allocation5] ss:$8 sps:$4 sm:$0xff]   ;;  %v4638_v50 = vld [vmem:[#allocation5 + $0x10] ss:$8 sps:$4 sm:$0xff]   ;;  %v4643_v52 = vld [vmem:[#allocation5 + $0x24] ss:$8 sps:$4 sm:$0xff]  }
 0x551   :  { %v1586_v59 = vadd.f32 %v1577_v47, %v1570_v57  ;;  %v1571_v60 = vsel %vm1563_vm13, %v1559_v49, %v1567_v56  ;;  %v4646_v55 = vld [vmem:[#allocation5 + $0x34] ss:$8 sps:$4 sm:$0xff]   ;;  %v4644_v56 = vld [vmem:[#allocation5 + $0x30] ss:$8 sps:$4 sm:$0xff]   ;;  %v4649_v57 = vld [vmem:[#allocation5 + $0x44] ss:$8 sps:$4 sm:$0xff]  }
 0x552   :  { %v1587_v62 = vadd.f32 %v1581_v54, %v1571_v60  ;;  %v4641_v54 = vld [vmem:[#allocation5 + $0x20] ss:$8 sps:$4 sm:$0xff]   ;;  %v4650_v60 = vld [vmem:[#allocation5 + $0x50] ss:$8 sps:$4 sm:$0xff]  }
 0x553   :  { %v5365_v63 = vpack.c.bf16 %v1586_v59, %v1584_v58  ;;  %v4647_v58 = vld [vmem:[#allocation5 + $0x40] ss:$8 sps:$4 sm:$0xff]   ;;  %v4652_v59 = vld [vmem:[#allocation5 + $0x54] ss:$8 sps:$4 sm:$0xff]  }
 0x554   :  { %v5367_v0 = vpack.c.bf16 %v1587_v62, %v1585_v61  ;;  %v4655_v61 = vld [vmem:[#allocation5 + $0x64] ss:$8 sps:$4 sm:$0xff]   ;;  %v4653_v62 = vld [vmem:[#allocation5 + $0x60] ss:$8 sps:$4 sm:$0xff]  }
 0x556   :  { %1595 = vmatprep.subr.bf16.mxu0 %v5367_v0 }
 0x557   :  { %1596 = vmatpush1.bf16.msra.mxu0 %v5365_v63 }
 0x558   :  { %1675 = vmatprep.subr.bf16.mxu0 %v5367_v0 }
 0x55a   :  { %4011 = vmatmul.mubr.msk.bf16.vlgmr.msra.gmra.mrb[20].mxu0 %vm1591_vm14, %v1590_v1  ;;  %v4658_v1 = vld [vmem:[#allocation5 + $0x74] ss:$8 sps:$4 sm:$0xff]  }
 0x55b   :  { %1676 = vmatpush1.bf16.msra.mxu0 %v5365_v63  ;;  %1707 = vmatprep.mubr.bf16.mxu0 %v5012_v20 }
 0x55c   :  { %1911 = vmatprep.subr.bf16.mxu0 %v4589_v2  ;;  %v4656_v2 = vld [vmem:[#allocation5 + $0x70] ss:$8 sps:$4 sm:$0xff]  }
 0x562   :  { %4013 = vmatmul.mubr.msk.bf16.vlgmr.msra.gmra.mrb[24].mxu0 %vm1591_vm14, %v4012_v3  ;;  %v4661_v3 = vld [vmem:[#allocation5 + $0x84] ss:$8 sps:$4 sm:$0xff]  }
 0x563   :  { %1912 = vmatpush1.bf16.msra.mxu0 %v4587_v4  ;;  %v4659_v4 = vld [vmem:[#allocation5 + $0x80] ss:$8 sps:$4 sm:$0xff]  }
 0x564   :  { %1913 = vmatprep.subr.bf16.mxu0 %v4592_v5  ;;  %v4664_v5 = vld [vmem:[#allocation5 + $0x94] ss:$8 sps:$4 sm:$0xff]  }
 0x567   :  { %1914 = vmatpush1.bf16.msra.mxu0 %v4590_v6  ;;  %v4662_v6 = vld [vmem:[#allocation5 + $0x90] ss:$8 sps:$4 sm:$0xff]  }
 0x568   :  { %1915 = vmatprep.subr.bf16.mxu0 %v4595_v7  ;;  %v4667_v7 = vld [vmem:[#allocation5 + $0xa4] ss:$8 sps:$4 sm:$0xff]  }
 0x56b   :  { %1916 = vmatpush1.bf16.msra.mxu0 %v4593_v8  ;;  %v4665_v8 = vld [vmem:[#allocation5 + $0xa0] ss:$8 sps:$4 sm:$0xff]  }
 0x56c   :  { %1917 = vmatprep.subr.bf16.mxu0 %v4598_v9  ;;  %v4670_v9 = vld [vmem:[#allocation5 + $0xb4] ss:$8 sps:$4 sm:$0xff]  }
 0x56f   :  { %1918 = vmatpush1.bf16.msra.mxu0 %v4596_v10  ;;  %v4668_v10 = vld [vmem:[#allocation5 + $0xb0] ss:$8 sps:$4 sm:$0xff]  }
 0x570   :  { %1919 = vmatprep.subr.bf16.mxu0 %v4601_v11  ;;  %v4673_v11 = vld [vmem:[#allocation5 + $0xc4] ss:$8 sps:$4 sm:$0xff]  }
 0x573   :  { %1920 = vmatpush1.bf16.msra.mxu0 %v4599_v12  ;;  %v4671_v12 = vld [vmem:[#allocation5 + $0xc0] ss:$8 sps:$4 sm:$0xff]  }
 0x574   :  { %1921 = vmatprep.subr.bf16.mxu0 %v4604_v13  ;;  %v4676_v13 = vld [vmem:[#allocation5 + $0xd4] ss:$8 sps:$4 sm:$0xff]  }
 0x577   :  { %1922 = vmatpush1.bf16.msra.mxu0 %v4602_v14  ;;  %v4674_v14 = vld [vmem:[#allocation5 + $0xd0] ss:$8 sps:$4 sm:$0xff]  }
 0x578   :  { %1923 = vmatprep.subr.bf16.mxu0 %v4607_v15  ;;  %v4679_v15 = vld [vmem:[#allocation5 + $0xe4] ss:$8 sps:$4 sm:$0xff]  }
 0x57b   :  { %1924 = vmatpush1.bf16.msra.mxu0 %v4605_v16  ;;  %v4677_v16 = vld [vmem:[#allocation5 + $0xe0] ss:$8 sps:$4 sm:$0xff]  }
 0x57c   :  { %1925 = vmatprep.subr.bf16.mxu0 %v4610_v17  ;;  %v4682_v17 = vld [vmem:[#allocation5 + $0xf4] ss:$8 sps:$4 sm:$0xff]  }
 0x57f   :  { %1926 = vmatpush1.bf16.msra.mxu0 %v4608_v18  ;;  %v4680_v18 = vld [vmem:[#allocation5 + $0xf0] ss:$8 sps:$4 sm:$0xff]  }
 0x580   :  { %1927 = vmatprep.subr.bf16.mxu0 %v4613_v19 }
 0x583   :  { %1928 = vmatpush1.bf16.msra.mxu0 %v4611_v22  ;;  %v4078_v22 = vld [vmem:[%s5572_s9 + $0x8] sm:$0xf] }
 0x584   :  { %1929 = vmatprep.subr.bf16.mxu0 %v4616_v25  ;;  %v4683_v25 = vld [vmem:[#allocation5 + $0x200] ss:$8 sps:$4 sm:$0xff]  }
 0x587   :  { %1930 = vmatpush1.bf16.msra.mxu0 %v4614_v26  ;;  %v4685_v26 = vld [vmem:[#allocation5 + $0x204] ss:$8 sps:$4 sm:$0xff]  }
 0x588   :  { %1931 = vmatprep.subr.bf16.mxu0 %v4619_v27  ;;  %v4688_v27 = vld [vmem:[#allocation5 + $0x214] ss:$8 sps:$4 sm:$0xff]  }
 0x58b   :  { %1932 = vmatpush1.bf16.msra.mxu0 %v4617_v28  ;;  %v4686_v28 = vld [vmem:[#allocation5 + $0x210] ss:$8 sps:$4 sm:$0xff]  }
 0x58c   :  { %1933 = vmatprep.subr.bf16.mxu0 %v4622_v29  ;;  %v4691_v29 = vld [vmem:[#allocation5 + $0x224] ss:$8 sps:$4 sm:$0xff]  }
 0x58f   :  { %1934 = vmatpush1.bf16.msra.mxu0 %v4620_v30  ;;  %v4692_v30 = vld [vmem:[#allocation5 + $0x230] ss:$8 sps:$4 sm:$0xff]  }
 0x590   :  { %1935 = vmatprep.subr.bf16.mxu0 %v4625_v31  ;;  %v4697_v31 = vld [vmem:[#allocation5 + $0x244] ss:$8 sps:$4 sm:$0xff]  }
 0x593   :  { %1936 = vmatpush1.bf16.msra.mxu0 %v4623_v32  ;;  %v4695_v32 = vld [vmem:[#allocation5 + $0x240] ss:$8 sps:$4 sm:$0xff]  }
 0x594   :  { %1937 = vmatprep.subr.bf16.mxu0 %v4628_v33  ;;  %v4700_v33 = vld [vmem:[#allocation5 + $0x254] ss:$8 sps:$4 sm:$0xff]  }
 0x597   :  { %1938 = vmatpush1.bf16.msra.mxu0 %v4626_v34  ;;  %v4698_v34 = vld [vmem:[#allocation5 + $0x250] ss:$8 sps:$4 sm:$0xff]  }
 0x598   :  { %1939 = vmatprep.subr.bf16.mxu0 %v4631_v35  ;;  %v4703_v35 = vld [vmem:[#allocation5 + $0x264] ss:$8 sps:$4 sm:$0xff]  }
 0x59b   :  { %1940 = vmatpush1.bf16.msra.mxu0 %v4629_v36  ;;  %v4701_v36 = vld [vmem:[#allocation5 + $0x260] ss:$8 sps:$4 sm:$0xff]  }
 0x59c   :  { %1941 = vmatprep.subr.bf16.mxu0 %v4634_v37  ;;  %v4706_v37 = vld [vmem:[#allocation5 + $0x274] ss:$8 sps:$4 sm:$0xff]  }
 0x59f   :  { %1942 = vmatpush1.bf16.msra.mxu0 %v4632_v38  ;;  %v4704_v38 = vld [vmem:[#allocation5 + $0x270] ss:$8 sps:$4 sm:$0xff]  }
 0x5a0   :  { %2112 = vmatprep.subr.bf16.mxu0 %v4637_v39  ;;  %v4709_v39 = vld [vmem:[#allocation5 + $0x284] ss:$8 sps:$4 sm:$0xff]  }
 0x62d   :  { %v5382_v40 = vpop.f32.mrb[20].mxu0 }
 0x62e   :  { %v1631_v41 = vpop.f32.mrb[21].mxu0  ;;  %v1636_v19 = vpack.c.bf16 %v5382_v40, %v5382_v40  ;;  %v4707_v40 = vld [vmem:[#allocation5 + $0x280] ss:$8 sps:$4 sm:$0xff]  }
 0x62f   :  { %v1633_v42 = vpop.f32.mrb[22].mxu0  ;;  %v1637_v49 = vpack.c.bf16 %v1631_v41, %v1631_v41  ;;  %v4712_v41 = vld [vmem:[#allocation5 + $0x294] ss:$8 sps:$4 sm:$0xff]  }
 0x630   :  { %v1634_v43 = vpop.f32.mrb[23].mxu0  ;;  %v4710_v42 = vld [vmem:[#allocation5 + $0x290] ss:$8 sps:$4 sm:$0xff]  }
 0x631   :  { %v4715_v43 = vld [vmem:[#allocation5 + $0x2a4] ss:$8 sps:$4 sm:$0xff]  }
 0x635   :  { %v1709_v44 = vpop.f32.mrb[24].mxu0 }
 0x636   :  { %v1711_v45 = vpop.f32.mrb[25].mxu0  ;;  %v1716_v46 = vpack.c.bf16 %v1709_v44, %v1709_v44  ;;  %v4713_v44 = vld [vmem:[#allocation5 + $0x2a0] ss:$8 sps:$4 sm:$0xff]  }
 0x637   :  { %v1717_v21 = vpack.c.bf16 %v1711_v45, %v1711_v45  ;;  %v1713_v23 = vpop.f32.mrb[26].mxu0  ;;  %v4718_v45 = vld [vmem:[#allocation5 + $0x2b4] ss:$8 sps:$4 sm:$0xff]  }
 0x638   :  { %v1714_v47 = vpop.f32.mrb[27].mxu0  ;;  %v4721_v23 = vld [vmem:[#allocation5 + $0x2c4] ss:$8 sps:$4 sm:$0xff]  }
 0x639   :  { %1943 = vmatprep.mubr.bf16.mxu0 %v1717_v21  ;;  %v4716_v21 = vld [vmem:[#allocation5 + $0x2b0] ss:$8 sps:$4 sm:$0xff]  }
 0x63a   :  { %1944 = vmatmul.mubr.bf16.vlgmr.msra.gmra.mrb[28].mxu0 %v1716_v46  ;;  %v4724_v46 = vld [vmem:[#allocation5 + $0x2d4] ss:$8 sps:$4 sm:$0xff]   ;;  %v4722_v47 = vld [vmem:[#allocation5 + $0x2d0] ss:$8 sps:$4 sm:$0xff]  }
 0x63b   :  { %2113 = vmatpush1.bf16.msra.mxu0 %v4635_v24  ;;  %2144 = vmatprep.mubr.bf16.mxu0 %v1637_v49  ;;  %v4719_v24 = vld [vmem:[#allocation5 + $0x2c0] ss:$8 sps:$4 sm:$0xff]   ;;  %v4727_v49 = vld [vmem:[#allocation5 + $0x2e4] ss:$8 sps:$4 sm:$0xff]  }
 0x63c   :  { %2114 = vmatprep.subr.bf16.mxu0 %v4640_v48  ;;  %v4725_v48 = vld [vmem:[#allocation5 + $0x2e0] ss:$8 sps:$4 sm:$0xff]  }
 0x63f   :  { %2115 = vmatpush1.bf16.msra.mxu0 %v4638_v50  ;;  %v4730_v50 = vld [vmem:[#allocation5 + $0x2f4] ss:$8 sps:$4 sm:$0xff]  }
 0x640   :  { %2116 = vmatprep.subr.bf16.mxu0 %v4643_v52  ;;  %v4728_v52 = vld [vmem:[#allocation5 + $0x2f0] ss:$8 sps:$4 sm:$0xff]  }
 0x643   :  { %2117 = vmatpush1.bf16.msra.mxu0 %v4641_v54 }
 0x644   :  { %2118 = vmatprep.subr.bf16.mxu0 %v4646_v55 }
 0x647   :  { %2119 = vmatpush1.bf16.msra.mxu0 %v4644_v56 }
 0x648   :  { %2120 = vmatprep.subr.bf16.mxu0 %v4649_v57 }
 0x64b   :  { %2121 = vmatpush1.bf16.msra.mxu0 %v4647_v58 }
 0x64c   :  { %2122 = vmatprep.subr.bf16.mxu0 %v4652_v59 }
 0x64f   :  { %2123 = vmatpush1.bf16.msra.mxu0 %v4650_v60 }
 0x650   :  { %2124 = vmatprep.subr.bf16.mxu0 %v4655_v61 }
 0x653   :  { %2125 = vmatpush1.bf16.msra.mxu0 %v4653_v62 }
 0x654   :  { %2126 = vmatprep.subr.bf16.mxu0 %v4658_v1 }
 0x657   :  { %2127 = vmatpush1.bf16.msra.mxu0 %v4656_v2 }
 0x658   :  { %2128 = vmatprep.subr.bf16.mxu0 %v4661_v3 }
 0x65b   :  { %2129 = vmatpush1.bf16.msra.mxu0 %v4659_v4 }
 0x65c   :  { %2130 = vmatprep.subr.bf16.mxu0 %v4664_v5 }
 0x65f   :  { %2131 = vmatpush1.bf16.msra.mxu0 %v4662_v6 }
 0x660   :  { %2132 = vmatprep.subr.bf16.mxu0 %v4667_v7 }
 0x663   :  { %2133 = vmatpush1.bf16.msra.mxu0 %v4665_v8  ;;  %v4779_v8 = vld [vmem:[#allocation7] ss:$8 sps:$4 sm:$0xff]  }
 0x664   :  { %2134 = vmatprep.subr.bf16.mxu0 %v4670_v9  ;;  %v4781_v9 = vld [vmem:[#allocation7 + $0x4] ss:$8 sps:$4 sm:$0xff]  }
 0x667   :  { %2135 = vmatpush1.bf16.msra.mxu0 %v4668_v10  ;;  %v4784_v10 = vld [vmem:[#allocation7 + $0x14] ss:$8 sps:$4 sm:$0xff]  }
 0x668   :  { %2136 = vmatprep.subr.bf16.mxu0 %v4673_v11  ;;  %v4782_v11 = vld [vmem:[#allocation7 + $0x10] ss:$8 sps:$4 sm:$0xff]  }
 0x66b   :  { %2137 = vmatpush1.bf16.msra.mxu0 %v4671_v12  ;;  %v4787_v12 = vld [vmem:[#allocation7 + $0x24] ss:$8 sps:$4 sm:$0xff]  }
 0x66c   :  { %2138 = vmatprep.subr.bf16.mxu0 %v4676_v13  ;;  %v4785_v13 = vld [vmem:[#allocation7 + $0x20] ss:$8 sps:$4 sm:$0xff]  }
 0x66f   :  { %2139 = vmatpush1.bf16.msra.mxu0 %v4674_v14  ;;  %v4790_v14 = vld [vmem:[#allocation7 + $0x34] ss:$8 sps:$4 sm:$0xff]  }
 0x670   :  { %2140 = vmatprep.subr.bf16.mxu0 %v4679_v15  ;;  %v4788_v15 = vld [vmem:[#allocation7 + $0x30] ss:$8 sps:$4 sm:$0xff]  }
 0x673   :  { %2141 = vmatpush1.bf16.msra.mxu0 %v4677_v16  ;;  %v4793_v16 = vld [vmem:[#allocation7 + $0x44] ss:$8 sps:$4 sm:$0xff]  }
 0x674   :  { %2142 = vmatprep.subr.bf16.mxu0 %v4682_v17  ;;  %v4791_v17 = vld [vmem:[#allocation7 + $0x40] ss:$8 sps:$4 sm:$0xff]  }
 0x677   :  { %2143 = vmatpush1.bf16.msra.mxu0 %v4680_v18  ;;  %v4796_v18 = vld [vmem:[#allocation7 + $0x54] ss:$8 sps:$4 sm:$0xff]  }
 0x678   :  { %2158 = vmatprep.subr.bf16.mxu0 %v5367_v0  ;;  %v4689_v0 = vld [vmem:[#allocation5 + $0x220] ss:$8 sps:$4 sm:$0xff]  }
 0x67a   :  { %2145 = vmatmul.mubr.bf16.vlgmr.msra.gmra.mrb[32].mxu0 %v1636_v19  ;;  %v4794_v19 = vld [vmem:[#allocation7 + $0x50] ss:$8 sps:$4 sm:$0xff]  }
 0x67b   :  { %2159 = vmatpush1.bf16.msra.mxu0 %v5365_v63  ;;  %2190 = vmatprep.mubr.bf16.mxu0 %v5012_v20  ;;  %v4694_v63 = vld [vmem:[#allocation5 + $0x234] ss:$8 sps:$4 sm:$0xff]  }
 0x67c   :  { %2394 = vmatprep.subr.bf16.mxu0 %v4685_v26  ;;  %v4802_v26 = vld [vmem:[#allocation7 + $0x74] ss:$8 sps:$4 sm:$0xff]  }
 0x682   :  { %4079 = vmatmul.mubr.msk.bf16.vlgmr.msra.gmra.mrb[36].mxu0 %vm1591_vm14, %v4078_v22  ;;  %v4799_v22 = vld [vmem:[#allocation7 + $0x64] ss:$8 sps:$4 sm:$0xff]  }
 0x683   :  { %2395 = vmatpush1.bf16.msra.mxu0 %v4683_v25  ;;  %v4797_v25 = vld [vmem:[#allocation7 + $0x60] ss:$8 sps:$4 sm:$0xff]  }
 0x684   :  { %2396 = vmatprep.subr.bf16.mxu0 %v4688_v27  ;;  %v4800_v27 = vld [vmem:[#allocation7 + $0x70] ss:$8 sps:$4 sm:$0xff]  }
 0x687   :  { %2397 = vmatpush1.bf16.msra.mxu0 %v4686_v28  ;;  %v4805_v28 = vld [vmem:[#allocation7 + $0x84] ss:$8 sps:$4 sm:$0xff]  }
 0x688   :  { %2398 = vmatprep.subr.bf16.mxu0 %v4691_v29  ;;  %v4803_v29 = vld [vmem:[#allocation7 + $0x80] ss:$8 sps:$4 sm:$0xff]  }
 0x68b   :  { %2399 = vmatpush1.bf16.msra.mxu0 %v4689_v0  ;;  %v4808_v0 = vld [vmem:[#allocation7 + $0x94] ss:$8 sps:$4 sm:$0xff]  }
 0x68c   :  { %2400 = vmatprep.subr.bf16.mxu0 %v4694_v63  ;;  %v4806_v63 = vld [vmem:[#allocation7 + $0x90] ss:$8 sps:$4 sm:$0xff]  }
 0x68f   :  { %2401 = vmatpush1.bf16.msra.mxu0 %v4692_v30  ;;  %v4811_v30 = vld [vmem:[#allocation7 + $0xa4] ss:$8 sps:$4 sm:$0xff]  }
 0x690   :  { %2402 = vmatprep.subr.bf16.mxu0 %v4697_v31  ;;  %v2437_v31 = vld [vmem:[%s5574_s11] sm:$0x3] }
 0x693   :  { %2403 = vmatpush1.bf16.msra.mxu0 %v4695_v32  ;;  %v4809_v32 = vld [vmem:[#allocation7 + $0xa0] ss:$8 sps:$4 sm:$0xff]  }
 0x694   :  { %2404 = vmatprep.subr.bf16.mxu0 %v4700_v33  ;;  %v2442_v33 = vrot.slane %v2437_v31, %v5299_v51 }
 0x697   :  { %2405 = vmatpush1.bf16.msra.mxu0 %v4698_v34  ;;  %v4814_v34 = vld [vmem:[#allocation7 + $0xb4] ss:$8 sps:$4 sm:$0xff]  }
 0x698   :  { %2406 = vmatprep.subr.bf16.mxu0 %v4703_v35 }
 0x69b   :  { %2407 = vmatpush1.bf16.msra.mxu0 %v4701_v36  ;;  %v2446_v36 = vrot.slane %v2437_v31, %v5304_v53  ;;  %v4770_v31 = vld [vmem:[#allocation7 + $0x1d0] ss:$8 sps:$4 sm:$0xff]  }
 0x69c   :  { %2408 = vmatprep.subr.bf16.mxu0 %v4706_v37 }
 0x69f   :  { %2409 = vmatpush1.bf16.msra.mxu0 %v4704_v38 }
 0x6a0   :  { %2410 = vmatprep.subr.bf16.mxu0 %v4709_v39  ;;  %v2457_v39 = vld [vmem:[%s5575_s12] sm:$0x3] }
 0x6a3   :  { %2411 = vmatpush1.bf16.msra.mxu0 %v4707_v40 }
 0x6a4   :  { %2412 = vmatprep.subr.bf16.mxu0 %v4712_v41 }
 0x6a7   :  { %2413 = vmatpush1.bf16.msra.mxu0 %v4710_v42  ;;  %v4812_v42 = vld [vmem:[#allocation7 + $0xb0] ss:$8 sps:$4 sm:$0xff]  }
 0x6a8   :  { %2414 = vmatprep.subr.bf16.mxu0 %v4715_v43 }
 0x6ab   :  { %2415 = vmatpush1.bf16.msra.mxu0 %v4713_v44 }
 0x6ac   :  { %2416 = vmatprep.subr.bf16.mxu0 %v4718_v45  ;;  %v4817_v45 = vld [vmem:[#allocation7 + $0xc4] ss:$8 sps:$4 sm:$0xff]  }
 0x6af   :  { %2417 = vmatpush1.bf16.msra.mxu0 %v4716_v21 }
 0x6b0   :  { %2418 = vmatprep.subr.bf16.mxu0 %v4721_v23  ;;  %v2462_v23 = vrot.slane %v2457_v39, %v5299_v51 }
 0x6b3   :  { %2419 = vmatpush1.bf16.msra.mxu0 %v4719_v24 }
 0x6b4   :  { %2420 = vmatprep.subr.bf16.mxu0 %v4724_v46  ;;  %v2466_v46 = vrot.slane %v2457_v39, %v5304_v53 }
 0x6b7   :  { %2421 = vmatpush1.bf16.msra.mxu0 %v4722_v47 }
 0x6b8   :  { %2422 = vmatprep.subr.bf16.mxu0 %v4727_v49 }
 0x6bb   :  { %2423 = vmatpush1.bf16.msra.mxu0 %v4725_v48  ;;  %v4815_v48 = vld [vmem:[#allocation7 + $0xc0] ss:$8 sps:$4 sm:$0xff]  }
 0x6bc   :  { %2424 = vmatprep.subr.bf16.mxu0 %v4730_v50  ;;  %v4820_v50 = vld [vmem:[#allocation7 + $0xd4] ss:$8 sps:$4 sm:$0xff]  }
 0x6bf   :  { %2425 = vmatpush1.bf16.msra.mxu0 %v4728_v52 }
 0x6c0   :  { %3002 = vmatprep.subr.bf16.mxu0 %v4781_v9  ;;  %v4740_v9 = vld [vmem:[#allocation7 + $0x130] ss:$8 sps:$4 sm:$0xff]  }
 0x70d   :  { %v1945_v54 = vpop.f32.mrb[28].mxu0 }
 0x70e   :  { %v1947_v55 = vpop.f32.mrb[29].mxu0 }
 0x70f   :  { %v1949_v56 = vpop.f32.mrb[30].mxu0 }
 0x710   :  { %v1950_v57 = vpop.f32.mrb[31].mxu0 }
 0x711   :  { %v4818_v57 = vld [vmem:[#allocation7 + $0xd0] ss:$8 sps:$4 sm:$0xff]  }
 0x74d   :  { %v2146_v58 = vpop.f32.mrb[32].mxu0 }
 0x74e   :  { %v2147_v59 = vadd.f32 %v2146_v58, %v1945_v54  ;;  %v2148_v60 = vpop.f32.mrb[33].mxu0 }
 0x74f   :  { %v2149_v61 = vadd.f32 %v2148_v60, %v1947_v55  ;;  %v2150_v62 = vpop.f32.mrb[34].mxu0 }
 0x750   :  { %v2151_v1 = vpop.f32.mrb[35].mxu0  ;;  %v4733_v62 = vld [vmem:[#allocation7 + $0x104] ss:$8 sps:$4 sm:$0xff]  }
 0x751   :  { %v4821_v1 = vld [vmem:[#allocation7 + $0xe0] ss:$8 sps:$4 sm:$0xff]  }
 0x755   :  { %v2192_v2 = vpop.f32.mrb[36].mxu0 }
 0x756   :  { %v2194_v3 = vpop.f32.mrb[37].mxu0  ;;  %v2199_v6 = vpack.c.bf16 %v2192_v2, %v2192_v2  ;;  %v4731_v2 = vld [vmem:[#allocation7 + $0x100] ss:$8 sps:$4 sm:$0xff]  }
 0x757   :  { %v2200_v4 = vpack.c.bf16 %v2194_v3, %v2194_v3  ;;  %v2196_v5 = vpop.f32.mrb[38].mxu0  ;;  %v4114_v3 = vld [vmem:[%s5576_s13 + $0x2] sm:$0x3] }
 0x758   :  { %v2197_v7 = vpop.f32.mrb[39].mxu0  ;;  %v4734_v5 = vld [vmem:[#allocation7 + $0x110] ss:$8 sps:$4 sm:$0xff]  }
 0x759   :  { %2426 = vmatprep.mubr.bf16.mxu0 %v2200_v4  ;;  %v4736_v4 = vld [vmem:[#allocation7 + $0x114] ss:$8 sps:$4 sm:$0xff]   ;;  %v4737_v7 = vld [vmem:[#allocation7 + $0x120] ss:$8 sps:$4 sm:$0xff]  }
 0x75a   :  { %2427 = vmatmul.mubr.bf16.vlgmr.msra.gmra.mrb[40].mxu0 %v2199_v6  ;;  %v4739_v6 = vld [vmem:[#allocation7 + $0x124] ss:$8 sps:$4 sm:$0xff]  }
 0x75b   :  { %3003 = vmatpush1.bf16.msra.mxu0 %v4779_v8  ;;  %v4742_v8 = vld [vmem:[#allocation7 + $0x134] ss:$8 sps:$4 sm:$0xff]  }
 0x75c   :  { %3004 = vmatprep.subr.bf16.mxu0 %v4784_v10  ;;  %v4745_v10 = vld [vmem:[#allocation7 + $0x144] ss:$8 sps:$4 sm:$0xff]  }
 0x75f   :  { %3005 = vmatpush1.bf16.msra.mxu0 %v4782_v11  ;;  %v4743_v11 = vld [vmem:[#allocation7 + $0x140] ss:$8 sps:$4 sm:$0xff]  }
 0x760   :  { %3006 = vmatprep.subr.bf16.mxu0 %v4787_v12  ;;  %v4748_v12 = vld [vmem:[#allocation7 + $0x154] ss:$8 sps:$4 sm:$0xff]  }
 0x763   :  { %3007 = vmatpush1.bf16.msra.mxu0 %v4785_v13  ;;  %v4746_v13 = vld [vmem:[#allocation7 + $0x150] ss:$8 sps:$4 sm:$0xff]  }
 0x764   :  { %3008 = vmatprep.subr.bf16.mxu0 %v4790_v14  ;;  %v4751_v14 = vld [vmem:[#allocation7 + $0x164] ss:$8 sps:$4 sm:$0xff]  }
 0x767   :  { %3009 = vmatpush1.bf16.msra.mxu0 %v4788_v15  ;;  %v4749_v15 = vld [vmem:[#allocation7 + $0x160] ss:$8 sps:$4 sm:$0xff]  }
 0x768   :  { %3010 = vmatprep.subr.bf16.mxu0 %v4793_v16  ;;  %v4754_v16 = vld [vmem:[#allocation7 + $0x174] ss:$8 sps:$4 sm:$0xff]  }
 0x76b   :  { %3011 = vmatpush1.bf16.msra.mxu0 %v4791_v17  ;;  %v4752_v17 = vld [vmem:[#allocation7 + $0x170] ss:$8 sps:$4 sm:$0xff]  }
 0x76c   :  { %3012 = vmatprep.subr.bf16.mxu0 %v4796_v18  ;;  %v4757_v18 = vld [vmem:[#allocation7 + $0x184] ss:$8 sps:$4 sm:$0xff]  }
 0x76f   :  { %3013 = vmatpush1.bf16.msra.mxu0 %v4794_v19  ;;  %v4755_v19 = vld [vmem:[#allocation7 + $0x180] ss:$8 sps:$4 sm:$0xff]  }
 0x770   :  { %3014 = vmatprep.subr.bf16.mxu0 %v4799_v22  ;;  %v4760_v22 = vld [vmem:[#allocation7 + $0x194] ss:$8 sps:$4 sm:$0xff]  }
 0x773   :  { %3015 = vmatpush1.bf16.msra.mxu0 %v4797_v25  ;;  %v4758_v25 = vld [vmem:[#allocation7 + $0x190] ss:$8 sps:$4 sm:$0xff]  }
 0x774   :  { %3016 = vmatprep.subr.bf16.mxu0 %v4802_v26  ;;  %v4763_v26 = vld [vmem:[#allocation7 + $0x1a4] ss:$8 sps:$4 sm:$0xff]  }
 0x777   :  { %3017 = vmatpush1.bf16.msra.mxu0 %v4800_v27  ;;  %v4761_v27 = vld [vmem:[#allocation7 + $0x1a0] ss:$8 sps:$4 sm:$0xff]  }
 0x778   :  { %3018 = vmatprep.subr.bf16.mxu0 %v4805_v28  ;;  %v4766_v28 = vld [vmem:[#allocation7 + $0x1b4] ss:$8 sps:$4 sm:$0xff]  }
 0x77b   :  { %3019 = vmatpush1.bf16.msra.mxu0 %v4803_v29  ;;  %v4764_v29 = vld [vmem:[#allocation7 + $0x1b0] ss:$8 sps:$4 sm:$0xff]  }
 0x77c   :  { %3020 = vmatprep.subr.bf16.mxu0 %v4808_v0  ;;  %v4769_v0 = vld [vmem:[#allocation7 + $0x1c4] ss:$8 sps:$4 sm:$0xff]  }
 0x77f   :  { %3021 = vmatpush1.bf16.msra.mxu0 %v4806_v63  ;;  %v4767_v63 = vld [vmem:[#allocation7 + $0x1c0] ss:$8 sps:$4 sm:$0xff]  }
 0x780   :  { %3022 = vmatprep.subr.bf16.mxu0 %v4811_v30  ;;  %v4772_v30 = vld [vmem:[#allocation7 + $0x1d4] ss:$8 sps:$4 sm:$0xff]  }
 0x783   :  { %3023 = vmatpush1.bf16.msra.mxu0 %v4809_v32  ;;  %v4775_v32 = vld [vmem:[#allocation7 + $0x1e4] ss:$8 sps:$4 sm:$0xff]  }
 0x784   :  { %3024 = vmatprep.subr.bf16.mxu0 %v4814_v34  ;;  %v4778_v34 = vld [vmem:[#allocation7 + $0x1f4] ss:$8 sps:$4 sm:$0xff]  }
 0x787   :  { %3025 = vmatpush1.bf16.msra.mxu0 %v4812_v42 }
 0x788   :  { %3026 = vmatprep.subr.bf16.mxu0 %v4817_v45 }
 0x78b   :  { %3027 = vmatpush1.bf16.msra.mxu0 %v4815_v48  ;;  %v4181_v48 = vld [vmem:[%s5576_s13 + $0x4] sm:$0x3] }
 0x78c   :  { %3028 = vmatprep.subr.bf16.mxu0 %v4820_v50  ;;  %v4832_v50 = vld [vmem:[#allocation7 + $0x214] ss:$8 sps:$4 sm:$0xff]  }
 0x78f   :  { %3029 = vmatpush1.bf16.msra.mxu0 %v4818_v57  ;;  %v4836_v57 = vld [vmem:[#allocation7 + $0x230] ss:$8 sps:$4 sm:$0xff]  }
 0x82d   :  { %v2428_v35 = vpop.f32.mrb[40].mxu0 }
 0x82e   :  { %v2435_v37 = vadd.f32 %v2428_v35, %v2147_v59  ;;  %v2430_v38 = vpop.f32.mrb[41].mxu0  ;;  %v4823_v59 = vld [vmem:[#allocation7 + $0xe4] ss:$8 sps:$4 sm:$0xff]   ;;  %v4776_v35 = vld [vmem:[#allocation7 + $0x1f0] ss:$8 sps:$4 sm:$0xff]  }
 0x82f   :  { %v2436_v40 = vadd.f32 %v2430_v38, %v2149_v61  ;;  %v2432_v41 = vpop.f32.mrb[42].mxu0  ;;  %v2473_v61 = vld [vmem:[%s5576_s13] sm:$0x3]  ;;  %3030 = vmatprep.subr.bf16.mxu0 %v4823_v59 }
 0x830   :  { %v2449_v43 = vadd.f32 %v2442_v33, %v2435_v37  ;;  %v2433_v44 = vpop.f32.mrb[43].mxu0  ;;  %3031 = vmatpush1.bf16.msra.mxu0 %v4821_v1  ;;  %v4773_v33 = vld [vmem:[#allocation7 + $0x1e0] ss:$8 sps:$4 sm:$0xff]   ;;  %v4824_v37 = vld [vmem:[#allocation7 + $0xf0] ss:$8 sps:$4 sm:$0xff]  }
 0x831   :  { %v2450_v21 = vadd.f32 %v2446_v36, %v2436_v40  ;;  %v4826_v36 = vld [vmem:[#allocation7 + $0xf4] ss:$8 sps:$4 sm:$0xff]   ;;  %v4839_v59 = vld [vmem:[#allocation7 + $0x240] ss:$8 sps:$4 sm:$0xff]  }
 0x832   :  { %vm2451_vm15 = vcmp.gt.f32.partialorder %v2449_v43, 0.0  ;;  %v2453_v24 = vmul.f32 0.2, %v2449_v43  ;;  %3032 = vmatprep.subr.bf16.mxu0 %v4826_v36  ;;  %v4845_v1 = vld [vmem:[#allocation7 + $0x260] ss:$8 sps:$4 sm:$0xff]  }
 0x833   :  { %vm2452_vm0 = vcmp.gt.f32.partialorder %v2450_v21, 0.0  ;;  %v2454_v47 = vmul.f32 0.2, %v2450_v21 }
 0x834   :  { %v2455_v49 = vsel %vm2451_vm15, %v2449_v43, %v2453_v24  ;;  %3033 = vmatpush1.bf16.msra.mxu0 %v4824_v37 }
 0x835   :  { %v2456_v52 = vsel %vm2452_vm0, %v2450_v21, %v2454_v47  ;;  %v2469_v54 = vadd.f32 %v2462_v23, %v2455_v49  ;;  %v4829_v47 = vld [vmem:[#allocation7 + $0x204] ss:$8 sps:$4 sm:$0xff]   ;;  %v4827_v49 = vld [vmem:[#allocation7 + $0x200] ss:$8 sps:$4 sm:$0xff]  }
 0x836   :  { %v2470_v55 = vadd.f32 %v2466_v46, %v2456_v52  ;;  %v4830_v52 = vld [vmem:[#allocation7 + $0x210] ss:$8 sps:$4 sm:$0xff]  }
 0x837   :  { %v2471_v56 = vpack.c.bf16 %v2469_v54, %v2469_v54  ;;  %v4835_v54 = vld [vmem:[#allocation7 + $0x224] ss:$8 sps:$4 sm:$0xff]  }
 0x838   :  { %v5403_v58 = vpack.c.bf16 %v2470_v55, %v2470_v55  ;;  %v4833_v55 = vld [vmem:[#allocation7 + $0x220] ss:$8 sps:$4 sm:$0xff]  }
 0x839   :  { %v5406_v60 = vsel %vm2478_vm1, %v2471_v56, 0  ;;  %v4838_v56 = vld [vmem:[#allocation7 + $0x234] ss:$8 sps:$4 sm:$0xff]  }
 0x83a   :  { %4112 = vmatprep.subr.msk.bf16.mxu1 %vm2478_vm1, %v5403_v58 }
 0x83b   :  { %2486 = vmatpush1.bf16.msra.mxu1 %v5406_v60 }
 0x83c   :  { %4115 = vmatprep.subr.msk.bf16.mxu1 %vm2478_vm1, %v5403_v58 }
 0x83e   :  { %4113 = vmatmul.mubr.msk.bf16.vlgmr.msra.gmra.mrb[16].mxu1 %vm2474_vm2, %v2473_v61  ;;  %v4842_v61 = vld [vmem:[#allocation7 + $0x250] ss:$8 sps:$4 sm:$0xff]  }
 0x83f   :  { %2566 = vmatpush1.bf16.msra.mxu1 %v5406_v60  ;;  %2597 = vmatprep.mubr.bf16.mxu1 %v5012_v20 }
 0x840   :  { %2801 = vmatprep.subr.bf16.mxu1 %v4733_v62  ;;  %v4847_v62 = vld [vmem:[#allocation7 + $0x264] ss:$8 sps:$4 sm:$0xff]  }
 0x846   :  { %4116 = vmatmul.mubr.msk.bf16.vlgmr.msra.gmra.mrb[20].mxu1 %vm2474_vm2, %v4114_v3  ;;  %v4848_v3 = vld [vmem:[#allocation7 + $0x270] ss:$8 sps:$4 sm:$0xff]  }
 0x847   :  { %2802 = vmatpush1.bf16.msra.mxu1 %v4731_v2  ;;  %v4850_v2 = vld [vmem:[#allocation7 + $0x274] ss:$8 sps:$4 sm:$0xff]  }
 0x848   :  { %2803 = vmatprep.subr.bf16.mxu1 %v4736_v4  ;;  %v4853_v4 = vld [vmem:[#allocation7 + $0x284] ss:$8 sps:$4 sm:$0xff]  }
 0x84b   :  { %2804 = vmatpush1.bf16.msra.mxu1 %v4734_v5  ;;  %v4851_v5 = vld [vmem:[#allocation7 + $0x280] ss:$8 sps:$4 sm:$0xff]  }
 0x84c   :  { %2805 = vmatprep.subr.bf16.mxu1 %v4739_v6  ;;  %v4856_v6 = vld [vmem:[#allocation7 + $0x294] ss:$8 sps:$4 sm:$0xff]  }
 0x84f   :  { %2806 = vmatpush1.bf16.msra.mxu1 %v4737_v7  ;;  %v4854_v7 = vld [vmem:[#allocation7 + $0x290] ss:$8 sps:$4 sm:$0xff]  }
 0x850   :  { %2807 = vmatprep.subr.bf16.mxu1 %v4742_v8  ;;  %v4859_v8 = vld [vmem:[#allocation7 + $0x2a4] ss:$8 sps:$4 sm:$0xff]  }
 0x853   :  { %2808 = vmatpush1.bf16.msra.mxu1 %v4740_v9  ;;  %v4857_v9 = vld [vmem:[#allocation7 + $0x2a0] ss:$8 sps:$4 sm:$0xff]  }
 0x854   :  { %2809 = vmatprep.subr.bf16.mxu1 %v4745_v10  ;;  %v4862_v10 = vld [vmem:[#allocation7 + $0x2b4] ss:$8 sps:$4 sm:$0xff]  }
 0x857   :  { %2810 = vmatpush1.bf16.msra.mxu1 %v4743_v11  ;;  %v4860_v11 = vld [vmem:[#allocation7 + $0x2b0] ss:$8 sps:$4 sm:$0xff]  }
 0x858   :  { %2811 = vmatprep.subr.bf16.mxu1 %v4748_v12  ;;  %v4863_v12 = vld [vmem:[#allocation7 + $0x2c0] ss:$8 sps:$4 sm:$0xff]  }
 0x85b   :  { %2812 = vmatpush1.bf16.msra.mxu1 %v4746_v13  ;;  %v4865_v13 = vld [vmem:[#allocation7 + $0x2c4] ss:$8 sps:$4 sm:$0xff]  }
 0x85c   :  { %2813 = vmatprep.subr.bf16.mxu1 %v4751_v14  ;;  %v4868_v14 = vld [vmem:[#allocation7 + $0x2d4] ss:$8 sps:$4 sm:$0xff]  }
 0x85f   :  { %2814 = vmatpush1.bf16.msra.mxu1 %v4749_v15  ;;  %v4866_v15 = vld [vmem:[#allocation7 + $0x2d0] ss:$8 sps:$4 sm:$0xff]  }
 0x860   :  { %2815 = vmatprep.subr.bf16.mxu1 %v4754_v16  ;;  %v4869_v16 = vld [vmem:[#allocation7 + $0x2e0] ss:$8 sps:$4 sm:$0xff]  }
 0x863   :  { %2816 = vmatpush1.bf16.msra.mxu1 %v4752_v17  ;;  %v4871_v17 = vld [vmem:[#allocation7 + $0x2e4] ss:$8 sps:$4 sm:$0xff]  }
 0x864   :  { %2817 = vmatprep.subr.bf16.mxu1 %v4757_v18  ;;  %v4874_v18 = vld [vmem:[#allocation7 + $0x2f4] ss:$8 sps:$4 sm:$0xff]  }
 0x867   :  { %2818 = vmatpush1.bf16.msra.mxu1 %v4755_v19  ;;  %v4872_v19 = vld [vmem:[#allocation7 + $0x2f0] ss:$8 sps:$4 sm:$0xff]  }
 0x868   :  { %2819 = vmatprep.subr.bf16.mxu1 %v4760_v22 }
 0x86b   :  { %2820 = vmatpush1.bf16.msra.mxu1 %v4758_v25 }
 0x86c   :  { %2821 = vmatprep.subr.bf16.mxu1 %v4763_v26 }
 0x86f   :  { %2822 = vmatpush1.bf16.msra.mxu1 %v4761_v27 }
 0x870   :  { %2823 = vmatprep.subr.bf16.mxu1 %v4766_v28 }
 0x873   :  { %2824 = vmatpush1.bf16.msra.mxu1 %v4764_v29 }
 0x874   :  { %2825 = vmatprep.subr.bf16.mxu1 %v4769_v0 }
 0x877   :  { %2826 = vmatpush1.bf16.msra.mxu1 %v4767_v63 }
 0x878   :  { %2827 = vmatprep.subr.bf16.mxu1 %v4772_v30 }
 0x87b   :  { %2828 = vmatpush1.bf16.msra.mxu1 %v4770_v31 }
 0x87c   :  { %2829 = vmatprep.subr.bf16.mxu1 %v4775_v32 }
 0x87f   :  { %2830 = vmatpush1.bf16.msra.mxu1 %v4773_v33 }
 0x880   :  { %2831 = vmatprep.subr.bf16.mxu1 %v4778_v34 }
 0x883   :  { %2832 = vmatpush1.bf16.msra.mxu1 %v4776_v35 }
 0x884   :  { %4182 = vmatprep.subr.msk.bf16.mxu1 %vm2478_vm1, %v5403_v58  ;;  %v4841_v58 = vld [vmem:[#allocation7 + $0x244] ss:$8 sps:$4 sm:$0xff]  }
 0x911   :  { %v2519_v38 = vpop.f32.mrb[16].mxu1 }
 0x912   :  { %v2521_v39 = vpop.f32.mrb[17].mxu1  ;;  %v2526_v42 = vpack.c.bf16 %v2519_v38, %v2519_v38  ;;  %v4875_v38 = vld [vmem:[%s5581_s18 + $0x40] sm:$0xff]  }
 0x913   :  { %v2527_v40 = vpack.c.bf16 %v2521_v39, %v2521_v39  ;;  %v2523_v41 = vpop.f32.mrb[18].mxu1  ;;  %v4876_v39 = vld [vmem:[%s5581_s18] sm:$0xff]  }
 0x914   :  { %v2524_v43 = vpop.f32.mrb[19].mxu1  ;;  %v4878_v41 = vld [vmem:[%s5581_s18 + $0x8] sm:$0xff]  }
 0x915   :  { %3034 = vmatprep.mubr.bf16.mxu0 %v2527_v40  ;;  %v4877_v40 = vld [vmem:[%s5581_s18 + $0x48] sm:$0xff]   ;;  %v4882_v43 = vld [vmem:[%s5581_s18 + $0x10] sm:$0xff]  }
 0x916   :  { %3035 = vmatmul.mubr.bf16.vlgmr.msra.gmra.mrb[44].mxu0 %v2526_v42  ;;  %v4880_v42 = vld [vmem:[%s5581_s18 + $0x50] sm:$0xff]  }
 0x917   :  { %3407 = vmatprep.mubr.bf16.mxu0 %v5012_v20 }
 0x919   :  { %v2599_v44 = vpop.f32.mrb[20].mxu1 }
 0x91a   :  { %v2601_v45 = vpop.f32.mrb[21].mxu1  ;;  %v2606_v24 = vpack.c.bf16 %v2599_v44, %v2599_v44  ;;  %v4884_v44 = vld [vmem:[%s5581_s18 + $0x58] sm:$0xff]  }
 0x91b   :  { %v2607_v21 = vpack.c.bf16 %v2601_v45, %v2601_v45  ;;  %v2603_v23 = vpop.f32.mrb[22].mxu1  ;;  %v4886_v45 = vld [vmem:[%s5581_s18 + $0x18] sm:$0xff]  }
 0x91c   :  { %v2604_v46 = vpop.f32.mrb[23].mxu1  ;;  %v4890_v23 = vld [vmem:[%s5581_s18 + $0x20] sm:$0xff]  }
 0x91d   :  { %2833 = vmatprep.mubr.bf16.mxu1 %v2607_v21  ;;  %v4888_v21 = vld [vmem:[%s5581_s18 + $0x60] sm:$0xff]   ;;  %v4894_v46 = vld [vmem:[%s5581_s18 + $0x28] sm:$0xff]  }
 0x91e   :  { %2834 = vmatmul.mubr.bf16.vlgmr.msra.gmra.mrb[24].mxu1 %v2606_v24  ;;  %v4892_v24 = vld [vmem:[%s5581_s18 + $0x68] sm:$0xff]  }
 0x91f   :  { %3049 = vmatpush1.bf16.msra.mxu1 %v5406_v60  ;;  %3080 = vmatprep.mubr.bf16.mxu1 %v5012_v20  ;;  %v4844_v60 = vld [vmem:[#allocation7 + $0x254] ss:$8 sps:$4 sm:$0xff]  }
 0x920   :  { %3284 = vmatprep.subr.bf16.mxu1 %v4829_v47  ;;  %v4896_v47 = vld [vmem:[%s5581_s18 + $0x70] sm:$0xff]  }
 0x926   :  { %4183 = vmatmul.mubr.msk.bf16.vlgmr.msra.gmra.mrb[28].mxu1 %vm2474_vm2, %v4181_v48  ;;  %v4898_v48 = vld [vmem:[%s5581_s18 + $0x30] sm:$0xff]  }
 0x927   :  { %3285 = vmatpush1.bf16.msra.mxu1 %v4827_v49  ;;  %v3327_v49 = vld [vmem:[%s5578_s15] sm:$0x3] }
 0x928   :  { %3286 = vmatprep.subr.bf16.mxu1 %v4832_v50  ;;  %v3332_v50 = vrot.slane %v3327_v49, %v5299_v51 }
 0x92b   :  { %3287 = vmatpush1.bf16.msra.mxu1 %v4830_v52 }
 0x92c   :  { %3288 = vmatprep.subr.bf16.mxu1 %v4835_v54  ;;  %v3336_v54 = vrot.slane %v3327_v49, %v5304_v53 }
 0x92f   :  { %3289 = vmatpush1.bf16.msra.mxu1 %v4833_v55 }
 0x930   :  { %3290 = vmatprep.subr.bf16.mxu1 %v4838_v56 }
 0x933   :  { %3291 = vmatpush1.bf16.msra.mxu1 %v4836_v57  ;;  %v3347_v57 = vld [vmem:[%s5579_s16] sm:$0x3] }
 0x934   :  { %3292 = vmatprep.subr.bf16.mxu1 %v4841_v58 }
 0x937   :  { %3293 = vmatpush1.bf16.msra.mxu1 %v4839_v59 }
 0x938   :  { %3294 = vmatprep.subr.bf16.mxu1 %v4844_v60 }
 0x93b   :  { %3295 = vmatpush1.bf16.msra.mxu1 %v4842_v61 }
 0x93c   :  { %3296 = vmatprep.subr.bf16.mxu1 %v4847_v62 }
 0x93f   :  { %3297 = vmatpush1.bf16.msra.mxu1 %v4845_v1  ;;  %v3352_v1 = vrot.slane %v3347_v57, %v5299_v51  ;;  %v3363_v51 = vld [vmem:[%s5580_s17] sm:$0x1] }
 0x940   :  { %3298 = vmatprep.subr.bf16.mxu1 %v4850_v2 }
 0x943   :  { %3299 = vmatpush1.bf16.msra.mxu1 %v4848_v3  ;;  %v3356_v3 = vrot.slane %v3347_v57, %v5304_v53  ;;  %v4879_v53 = vld [vmem:[%s5581_s18 + $0xc0] sm:$0xff]  }
 0x944   :  { %3300 = vmatprep.subr.bf16.mxu1 %v4853_v4 }
 0x947   :  { %3301 = vmatpush1.bf16.msra.mxu1 %v4851_v5 }
 0x948   :  { %3302 = vmatprep.subr.bf16.mxu1 %v4856_v6 }
 0x94b   :  { %3303 = vmatpush1.bf16.msra.mxu1 %v4854_v7 }
 0x94c   :  { %3304 = vmatprep.subr.bf16.mxu1 %v4859_v8 }
 0x94f   :  { %3305 = vmatpush1.bf16.msra.mxu1 %v4857_v9 }
 0x950   :  { %3306 = vmatprep.subr.bf16.mxu1 %v4862_v10 }
 0x953   :  { %3307 = vmatpush1.bf16.msra.mxu1 %v4860_v11 }
 0x954   :  { %3308 = vmatprep.subr.bf16.mxu1 %v4865_v13  ;;  %v4881_v13 = vld [vmem:[%s5581_s18 + $0x80] sm:$0xff]  }
 0x957   :  { %3309 = vmatpush1.bf16.msra.mxu1 %v4863_v12  ;;  %v4218_v12 = vld [vmem:[%s5580_s17 + $0x1] sm:$0x1] }
 0x958   :  { %3310 = vmatprep.subr.bf16.mxu1 %v4868_v14  ;;  %v4883_v14 = vld [vmem:[%s5581_s18 + $0xc8] sm:$0xff]  }
 0x95b   :  { %3311 = vmatpush1.bf16.msra.mxu1 %v4866_v15  ;;  %v4885_v15 = vld [vmem:[%s5581_s18 + $0x88] sm:$0xff]  }
 0x95c   :  { %3312 = vmatprep.subr.bf16.mxu1 %v4871_v17  ;;  %v4891_v17 = vld [vmem:[%s5581_s18 + $0xd8] sm:$0xff]  }
 0x95f   :  { %3313 = vmatpush1.bf16.msra.mxu1 %v4869_v16  ;;  %v4889_v16 = vld [vmem:[%s5581_s18 + $0x90] sm:$0xff]  }
 0x960   :  { %3314 = vmatprep.subr.bf16.mxu1 %v4874_v18  ;;  %v4893_v18 = vld [vmem:[%s5581_s18 + $0x98] sm:$0xff]  }
 0x963   :  { %3315 = vmatpush1.bf16.msra.mxu1 %v4872_v19  ;;  %v4895_v19 = vld [vmem:[%s5581_s18 + $0xe0] sm:$0xff]  }
 0x964   :  { %4326 = vmatprep.subr.bf16.mxu1 %v4875_v38 }
 0x9e9   :  { %v3036_v22 = vpop.f32.mrb[44].mxu0 }
 0x9ea   :  { %v3038_v25 = vpop.f32.mrb[45].mxu0 }
 0x9eb   :  { %v3040_v26 = vpop.f32.mrb[46].mxu0 }
 0x9ec   :  { %v3041_v27 = vpop.f32.mrb[47].mxu0  ;;  %v4900_v26 = vld [vmem:[%s5581_s18 + $0x78] sm:$0xff]  }
 0x9ed   :  { %v4901_v27 = vld [vmem:[%s5581_s18 + $0xa8] sm:$0xff]  }
 0x9f1   :  { %v2835_v28 = vpop.f32.mrb[24].mxu1 }
 0x9f2   :  { %v3037_v29 = vadd.f32 %v3036_v22, %v2835_v28  ;;  %v2837_v0 = vpop.f32.mrb[25].mxu1  ;;  %v4897_v22 = vld [vmem:[%s5581_s18 + $0xa0] sm:$0xff]   ;;  %v4902_v28 = vld [vmem:[%s5581_s18 + $0x38] sm:$0xff]  }
 0x9f3   :  { %v3039_v63 = vadd.f32 %v3038_v25, %v2837_v0  ;;  %v2839_v30 = vpop.f32.mrb[26].mxu1  ;;  %v4899_v25 = vld [vmem:[%s5581_s18 + $0xe8] sm:$0xff]   ;;  %v4904_v0 = vld [vmem:[%s5581_s18 + $0xb0] sm:$0xff]  }
 0x9f4   :  { %v2840_v31 = vpop.f32.mrb[27].mxu1  ;;  %v4906_v30 = vld [vmem:[%s5581_s18 + $0xb8] sm:$0xff]  }
 0x9f9   :  { %v3082_v32 = vpop.f32.mrb[28].mxu1 }
 0x9fa   :  { %v3084_v33 = vpop.f32.mrb[29].mxu1  ;;  %v3089_v36 = vpack.c.bf16 %v3082_v32, %v3082_v32 }
 0x9fb   :  { %v3090_v34 = vpack.c.bf16 %v3084_v33, %v3084_v33  ;;  %v3086_v35 = vpop.f32.mrb[30].mxu1 }
 0x9fc   :  { %v3087_v37 = vpop.f32.mrb[31].mxu1 }
 0x9fd   :  { %3316 = vmatprep.mubr.bf16.mxu1 %v3090_v34 }
 0x9fe   :  { %3317 = vmatmul.mubr.bf16.vlgmr.msra.gmra.mrb[32].mxu1 %v3089_v36 }
 0x9ff   :  { %4327 = vmatpush3.bf16.msra.mxu1 %v4876_v39 }
 0xa00   :  { %4328 = vmatprep.subr.bf16.mxu1 %v4877_v40 }
 0xa03   :  { %4329 = vmatpush3.bf16.msra.mxu1 %v4878_v41 }
 0xa04   :  { %4330 = vmatprep.subr.bf16.mxu1 %v4880_v42 }
 0xa07   :  { %4331 = vmatpush3.bf16.msra.mxu1 %v4882_v43 }
 0xa08   :  { %4332 = vmatprep.subr.bf16.mxu1 %v4884_v44 }
 0xa0b   :  { %4333 = vmatpush3.bf16.msra.mxu1 %v4886_v45 }
 0xa0c   :  { %4334 = vmatprep.subr.bf16.mxu1 %v4888_v21 }
 0xa0f   :  { %4335 = vmatpush3.bf16.msra.mxu1 %v4890_v23 }
 0xa10   :  { %4336 = vmatprep.subr.bf16.mxu1 %v4892_v24 }
 0xa13   :  { %4337 = vmatpush3.bf16.msra.mxu1 %v4894_v46 }
 0xa14   :  { %4338 = vmatprep.subr.bf16.mxu1 %v4896_v47 }
 0xa17   :  { %4339 = vmatpush3.bf16.msra.mxu1 %v4898_v48 }
 0xa18   :  { %4340 = vmatprep.subr.bf16.mxu1 %v4900_v26 }
 0xa1b   :  { %4341 = vmatpush3.bf16.msra.mxu1 %v4902_v28 }
 0xad1   :  { %v3318_v52 = vpop.f32.mrb[32].mxu1 }
 0xad2   :  { %v3325_v55 = vadd.f32 %v3318_v52, %v3037_v29  ;;  %v3320_v56 = vpop.f32.mrb[33].mxu1  ;;  %v4903_v29 = vld [vmem:[%s5581_s18 + $0xf0] sm:$0xff]  }
 0xad3   :  { %v3326_v58 = vadd.f32 %v3320_v56, %v3039_v63  ;;  %v3322_v59 = vpop.f32.mrb[34].mxu1  ;;  %v4905_v63 = vld [vmem:[%s5581_s18 + $0xf8] sm:$0xff]  }
 0xad4   :  { %v3339_v60 = vadd.f32 %v3332_v50, %v3325_v55  ;;  %v3323_v61 = vpop.f32.mrb[35].mxu1  ;;  %v4285_v50 = vld [vmem:[%s5582_s19] ss:$0 sm:$0xff]  ;;  %s5013_s19 = smov 127  }
 0xad5   :  { %v3340_v62 = vadd.f32 %v3336_v54, %v3326_v58 }
 0xad6   :  { %vm3341_vm3 = vcmp.gt.f32.partialorder %v3339_v60, 0.0  ;;  %v3343_v2 = vmul.f32 0.2, %v3339_v60 }
 0xad7   :  { %vm3342_vm4 = vcmp.gt.f32.partialorder %v3340_v62, 0.0  ;;  %v3344_v4 = vmul.f32 0.2, %v3340_v62 }
 0xad8   :  { %v3345_v5 = vsel %vm3341_vm3, %v3339_v60, %v3343_v2 }
 0xad9   :  { %v3346_v6 = vsel %vm3342_vm4, %v3340_v62, %v3344_v4  ;;  %v3359_v7 = vadd.f32 %v3352_v1, %v3345_v5 }
 0xada   :  { %v3360_v8 = vadd.f32 %v3356_v3, %v3346_v6 }
 0xadb   :  { %v3361_v9 = vpack.c.bf16 %v3359_v7, %v3359_v7 }
 0xadc   :  { %v3362_v10 = vpack.c.bf16 %v3360_v8, %v3360_v8 }
 0xadd   :  { %v3370_v11 = vsel %vm3368_vm5, %v3361_v9, 0 }
 0xade   :  { %4216 = vmatprep.subr.msk.bf16.mxu0 %vm3368_vm5, %v3362_v10 }
 0xadf   :  { %3376 = vmatpush1.bf16.msra.mxu0 %v3370_v11 }
 0xae0   :  { %4219 = vmatprep.subr.msk.bf16.mxu0 %vm3368_vm5, %v3362_v10 }
 0xae2   :  { %4217 = vmatmul.mubr.msk.bf16.vlgmr.msra.gmra.mrb[48].mxu0 %vm3364_vm6, %v3363_v51 }
 0xae3   :  { %3456 = vmatpush1.bf16.msra.mxu0 %v3370_v11  ;;  %3487 = vmatprep.mubr.bf16.mxu0 %v5012_v20  ;;  %v4887_v20 = vld [vmem:[%s5581_s18 + $0xd0] sm:$0xff]  }
 0xae4   :  { %4304 = vmatprep.subr.bf16.mxu0 %v4879_v53 }
 0xaea   :  { %4220 = vmatmul.mubr.msk.bf16.vlgmr.msra.gmra.mrb[52].mxu0 %vm3364_vm6, %v4218_v12 }
 0xaeb   :  { %4305 = vmatpush3.bf16.msra.mxu0 %v4881_v13 }
 0xaec   :  { %4306 = vmatprep.subr.bf16.mxu0 %v4883_v14 }
 0xaef   :  { %4307 = vmatpush3.bf16.msra.mxu0 %v4885_v15 }
 0xaf0   :  { %4308 = vmatprep.subr.bf16.mxu0 %v4887_v20 }
 0xaf3   :  { %4309 = vmatpush3.bf16.msra.mxu0 %v4889_v16 }
 0xaf4   :  { %4310 = vmatprep.subr.bf16.mxu0 %v4891_v17 }
 0xaf7   :  { %4311 = vmatpush3.bf16.msra.mxu0 %v4893_v18 }
 0xaf8   :  { %4312 = vmatprep.subr.bf16.mxu0 %v4895_v19 }
 0xafb   :  { %4313 = vmatpush3.bf16.msra.mxu0 %v4897_v22 }
 0xafc   :  { %4314 = vmatprep.subr.bf16.mxu0 %v4899_v25 }
 0xaff   :  { %4315 = vmatpush3.bf16.msra.mxu0 %v4901_v27 }
 0xb00   :  { %4316 = vmatprep.subr.bf16.mxu0 %v4903_v29 }
 0xb03   :  { %4317 = vmatpush3.bf16.msra.mxu0 %v4904_v0 }
 0xb04   :  { %4318 = vmatprep.subr.bf16.mxu0 %v4905_v63 }
 0xb07   :  { %4319 = vmatpush3.bf16.msra.mxu0 %v4906_v30 }
 0xbb5   :  { %v3409_v31 = vpop.f32.mrb[48].mxu0 }
 0xbb6   :  { %v3411_v32 = vpop.f32.mrb[49].mxu0  ;;  %v3416_v35 = vpack.c.bf16 %v3409_v31, %v3409_v31 }
 0xbb7   :  { %v3417_v33 = vpack.c.bf16 %v3411_v32, %v3411_v32  ;;  %v3413_v34 = vpop.f32.mrb[50].mxu0 }
 0xbb8   :  { %v3414_v36 = vpop.f32.mrb[51].mxu0 }
 0xbb9   :  { %3795 = vmatprep.mubr.bf16.mxu1 %v3417_v33 }
 0xbba   :  { %3796 = vmatmul.mubr.bf16.vlgmr.msra.gmra.mrb[36].mxu1 %v3416_v35 }
 0xbbd   :  { %v3489_v37 = vpop.f32.mrb[52].mxu0 }
 0xbbe   :  { %v3491_v38 = vpop.f32.mrb[53].mxu0  ;;  %v3496_v41 = vpack.c.bf16 %v3489_v37, %v3489_v37 }
 0xbbf   :  { %v3497_v39 = vpack.c.bf16 %v3491_v38, %v3491_v38  ;;  %v3493_v40 = vpop.f32.mrb[54].mxu0 }
 0xbc0   :  { %v3494_v42 = vpop.f32.mrb[55].mxu0 }
 0xbc1   :  { %3659 = vmatprep.mubr.bf16.mxu0 %v3497_v39 }
 0xbc2   :  { %3660 = vmatmul.mubr.bf16.vlgmr.msra.gmra.mrb[56].mxu0 %v3496_v41 }
 0xc8d   :  { %v4342_v43 = vpop.f32.mrb[36].mxu1 }
 0xc8e   :  { %v4343_v44 = vpop.f32.mrb[37].mxu1 }
 0xc8f   :  { %v4344_v45 = vadd.f32 %v4343_v44, %v4342_v43  ;;  %v4345_v21 = vpop.f32.mrb[38].mxu1 }
 0xc90   :  { %v4346_v23 = vpop.f32.mrb[39].mxu1 }
 0xc95   :  { %v4320_v24 = vpop.f32.mrb[56].mxu0 }
 0xc96   :  { %v4321_v46 = vpop.f32.mrb[57].mxu0 }
 0xc97   :  { %v4322_v47 = vadd.f32 %v4321_v46, %v4320_v24  ;;  %v4323_v48 = vpop.f32.mrb[58].mxu0 }
 0xc98   :  { %v4324_v49 = vpop.f32.mrb[59].mxu0 }
 0xc99   :  { %v3798_v52 = vadd.f32 %v4344_v45, %v4322_v47 }
 0xc9b   :  { %v3810_v54 = vadd.f32 %v4285_v50, %v3798_v52 }
 0xc9d   :  { %v3818_v55 = vsel %vm3817_vm7, %v3810_v54, -inf  ;;  %v3811_v56 = vmul.f32 0.5, %v3810_v54 }
 0xc9e   :  { %3819 = vmax.xlane.f32.xlu0 %v3818_v55 }
 0xc9f   :  { %4907 = vtanh.f32 %v3811_v56 }
 0xca9   :  { %v4908_v57 = vpop.eup %4907 }
 0xcaa   :  { %v3813_v58 = vadd.f32 1.0, %v4908_v57 }
 0xcac   :  { %v3814_v59 = vmul.f32 0.5, %v3813_v58 }
 0xcae   :  { %3816 = vst.msk [vmem:[%s5583_s20] sm:$0x3] %vm3815_vm8, %v3814_v59  ;;  %s4979_s20 = scalar_lea.vmem %s3848_s24, 32 }
 0xcaf   :  { %p4980_p10 = scmp.ne.s32.totalorder %s3848_s24, %s4979_s20  ;;  %p4985_p12 = scmp.lt.s32.totalorder %s4979_s20, %s4979_s20 }
 0xcb1   :  { %p4986_p13 = por %p4985_p12, %p4984_p11 }
 0xcb3   :  { %p4987_p0 = pnand %p4986_p13, %p4980_p10 }
 0xd2b   :  { %v3820_v60 = vpop.xlane.xlu0 %3819 }
 0xd2c   :  { %v3821_v61 = vsub.f32 %v3810_v54, %v3820_v60 }
 0xd2e   :  { %v3822_v62 = vmul.f32 1.442695, %v3821_v61 }
 0xd30   :  { %4909 = vpow2.f32 %v3822_v62 }
 0xd3a   :  { %v4910_v1 = vpop.eup %4909 }
 0xd3b   :  { %3825 = vrot.lane.b32.xlu0 %v4910_v1, %s5013_s19 }
 0xdad   :  { %v3826_v2 = vpop.permute.xlu0 %3825 }
 0xdae   :  { %v3829_v3 = vsel %vm3828_vm9, %v3826_v2, 0.0 }
 0xdaf   :  { %3830 = vadd.xlane.f32.xlu1 %v3829_v3 }
 0xe3c   :  { %v3831_v4 = vpop.xlane.xlu1 %3830 }
 0xe3d   :  { %4911 = vrcp.f32 %v3831_v4 }
 0xe47   :  { %v4912_v5 = vpop.eup %4911 }
 0xe48   :  { %v3833_v6 = vmul.f32 %v4912_v5, %v4910_v1 }
 0xe4a   :  { %3835 = vrot.lane.b32.xlu1 %v3833_v6, %s5013_s19 }
 0xebc   :  { %v3836_v7 = vpop.permute.xlu1 %3835 }
 0xebd   :  { %3838 = vst.msk [vmem:[#allocation8] sm:$0x3] %vm3828_vm9, %v3836_v7 }
 0xebe   :  { %4990 = shalt.err (!%p4987_p0)
}
 0xebf   :  { %s4991_s0 = scalar_lea.hbm %s5584_s21, 32 }
 0xec0   :  { %p4992_p1 = scmp.ne.s32.totalorder %s5584_s21, %s4991_s0  ;;  %p4995_p2 = scmp.lt.u32.totalorder %s4991_s0, %s5584_s21 }
 0xec2   :  { %p4997_p3 = pnand %p4995_p2, %p4992_p1 }
 0xec4   :  { %5000 = shalt.err (!%p4997_p3)
}
 0xec5   :  { %3850 = dma.vmem_to_hbm [thread:$0]  %s3848_s24, 32, %s5584_s21, [#allocation4]  }
 0xec6   :  { %5005 = dma.done.wait [#allocation4], 32  }
 0xec7   :  { %5006 = vsyncadd [#allocation4], 4294967264 }
 0xec8   :  { %3856 = vsyncpa [#allocation3], 1 }
 0xec9   :  { %3857 = vsyncpa [#allocation6], 1 }
 0xeca   :  { %3858 = vsyncpa [#allocation4], 1 }

</bundles_post_ra>
